<compile_context>
chip_gen: v6e
topology: v6e:2x2x1
jax: 0.10.0
libtpu: 0.0.40
codegen_flags: <defaults>
</compile_context>

<pallas_src>
import functools

import jax
import jax.numpy as jnp
from jax.experimental import pallas as pl
from jax.experimental.pallas import tpu as pltpu

STATE_DIM = 32
ACTION_DIM = 4
ATT_HIDDEN = 128
H1 = 400
H2 = 300
H1_PAD = 512    # 400 zero-padded to a lane multiple
H2_PAD = 384    # 300 zero-padded to a lane multiple
OUT_PAD = 128   # 4 zero-padded to a full lane width (lane-dense stores)
MAX_ACTION = 2.0


def _actor_kernel(max_action,
                  state_ref,
                  wqkv_ref, bqkv_ref,
                  w_ow1_ref, b_ow1_ref,
                  w2_ref, b2_ref,
                  w3_ref, b3_ref,
                  out_ref):
    G, B, S = state_ref.shape                       # G groups per grid step

    x = state_ref[...].astype(jnp.bfloat16)         # [G, B, S]
    x2 = x.reshape(G * B, S)                         # stack groups -> fill MXU M

    # --- Fused QKV projection (scale already folded into the Q columns) ---
    qkv = (jnp.dot(x2, wqkv_ref[...], preferred_element_type=jnp.float32)
           + bqkv_ref[...])                          # [G*B, 384] f32
    q = qkv[:, :ATT_HIDDEN].reshape(G, B, ATT_HIDDEN).astype(jnp.bfloat16)
    k = qkv[:, ATT_HIDDEN:2 * ATT_HIDDEN].reshape(G, B, ATT_HIDDEN).astype(jnp.bfloat16)
    v = qkv[:, 2 * ATT_HIDDEN:].reshape(G, B, ATT_HIDDEN).astype(jnp.bfloat16)

    # --- Per-group attention over the batch axis (scores are [B, B]) ---
    scores = jnp.einsum('gqd,gkd->gqk', q, k,
                        preferred_element_type=jnp.float32)      # [G, B, B]
    m = jnp.max(scores, axis=-1, keepdims=True)
    e = jnp.exp(scores - m)
    attn = e / jnp.sum(e, axis=-1, keepdims=True)                # exact softmax
    att = jnp.einsum('gqk,gkd->gqd', attn.astype(jnp.bfloat16), v,
                     preferred_element_type=jnp.float32)         # [G, B, 128]

    # --- MLP head (Wo folded into W1; hidden/output dims lane-padded) ---
    h = att.reshape(G * B, ATT_HIDDEN).astype(jnp.bfloat16)      # stack groups
    a1 = jnp.maximum(
        jnp.dot(h, w_ow1_ref[...], preferred_element_type=jnp.float32)
        + b_ow1_ref[...], 0.0)                                   # [G*B, 512]
    a2 = jnp.maximum(
        jnp.dot(a1.astype(jnp.bfloat16), w2_ref[...],
                preferred_element_type=jnp.float32)
        + b2_ref[...], 0.0)                                      # [G*B, 384]
    a3 = (jnp.dot(a2.astype(jnp.bfloat16), w3_ref[...],
                  preferred_element_type=jnp.float32)
          + b3_ref[...])                                         # [G*B, 128]

    out_ref[...] = (max_action * jnp.tanh(a3)).reshape(G, B, OUT_PAD)


def fuse_params(params, weight_dtype=jnp.bfloat16):
    """One-time host-side weight fusion / lane padding (mathematically exact
    before the bf16 weight cast)."""
    hp = jax.lax.Precision.HIGHEST
    scale = 1.0 / jnp.sqrt(jnp.float32(ATT_HIDDEN))
    # Fold the attention scale into the Q columns; fuse QKV into one matmul.
    wqkv = jnp.concatenate([params["wq"] * scale, params["wk"], params["wv"]], axis=1)
    bqkv = jnp.concatenate([params["bq"] * scale, params["bk"], params["bv"]], axis=1)
    # Fold output_layer into l1 (no nonlinearity between them).
    w_ow1 = jnp.dot(params["wo"], params["w1"], precision=hp)        # [128, 400]
    b_ow1 = jnp.dot(params["bo"], params["w1"], precision=hp) + params["b1"]
    # Zero-pad hidden/output dims to lane multiples; padded units stay zero.
    w_ow1 = jnp.pad(w_ow1, ((0, 0), (0, H1_PAD - H1)))
    b_ow1 = jnp.pad(b_ow1, ((0, 0), (0, H1_PAD - H1)))
    w2 = jnp.pad(params["w2"], ((0, H1_PAD - H1), (0, H2_PAD - H2)))
    b2 = jnp.pad(params["b2"], ((0, 0), (0, H2_PAD - H2)))
    w3 = jnp.pad(params["w3"], ((0, H2_PAD - H2), (0, OUT_PAD - ACTION_DIM)))
    b3 = jnp.pad(params["b3"], ((0, 0), (0, OUT_PAD - ACTION_DIM)))
    # Weights in bf16 (halved HBM traffic, native MXU path); biases stay f32.
    return dict(wqkv=wqkv.astype(weight_dtype), bqkv=bqkv.astype(jnp.float32),
                w_ow1=w_ow1.astype(weight_dtype), b_ow1=b_ow1.astype(jnp.float32),
                w2=w2.astype(weight_dtype), b2=b2.astype(jnp.float32),
                w3=w3.astype(weight_dtype), b3=b3.astype(jnp.float32))


def actor_forward_batched(states, fused, max_action=MAX_ACTION, groups_per_step=4):
    """states: [N, B, state_dim] f32 -> [N, B, action_dim] f32.

    Attention is computed independently within each of the N groups (exactly
    the per-call semantics of the PyTorch module); G groups are processed per
    grid step with the weights VMEM-resident across the whole grid.
    """
    N, B, S = states.shape
    G = min(groups_per_step, N)
    assert N % G == 0, "N must be divisible by groups_per_step"
    grid = (N // G,)

    weight_args = (fused["wqkv"], fused["bqkv"],
                   fused["w_ow1"], fused["b_ow1"],
                   fused["w2"], fused["b2"],
                   fused["w3"], fused["b3"])

    def resident(a):
        nd = a.ndim
        return pl.BlockSpec(a.shape, lambda n, _nd=nd: (0,) * _nd)  # DMA'd once

    in_specs = ([pl.BlockSpec((G, B, S), lambda n: (n, 0, 0))]
                + [resident(a) for a in weight_args])
    out_specs = pl.BlockSpec((G, B, OUT_PAD), lambda n: (n, 0, 0))

    kernel = functools.partial(_actor_kernel, float(max_action))
    out = pl.pallas_call(
        kernel,
        out_shape=jax.ShapeDtypeStruct((N, B, OUT_PAD), jnp.float32),
        grid=grid,
        in_specs=in_specs,
        out_specs=out_specs,
        compiler_params=pltpu.CompilerParams(
            dimension_semantics=("parallel",)),
    )(states, *weight_args)
    return out[..., :ACTION_DIM]


def actor_forward(state, fused, max_action=MAX_ACTION):
    """Original module signature: state [B, state_dim] -> [B, action_dim]."""
    out = actor_forward_batched(state[None], fused, max_action, groups_per_step=1)
    return out[0]


def init_params(key, state_dim=STATE_DIM, action_dim=ACTION_DIM):
    """Deterministic synthetic parameters, stored as [in, out] matrices."""
    def linear(key, fan_in, fan_out):
        kw, kb = jax.random.split(key)
        bound = 1.0 / jnp.sqrt(jnp.float32(fan_in))
        w = jax.random.uniform(kw, (fan_in, fan_out), jnp.float32, -bound, bound)
        b = jax.random.uniform(kb, (1, fan_out), jnp.float32, -bound, bound)
        return w, b

    keys = jax.random.split(key, 7)
    wq, bq = linear(keys[0], state_dim, ATT_HIDDEN)
    wk, bk = linear(keys[1], state_dim, ATT_HIDDEN)
    wv, bv = linear(keys[2], state_dim, ATT_HIDDEN)
    wo, bo = linear(keys[3], ATT_HIDDEN, state_dim)
    w1, b1 = linear(keys[4], state_dim, H1)
    w2, b2 = linear(keys[5], H1, H2)
    w3, b3 = linear(keys[6], H2, action_dim)
    return dict(wq=wq, bq=bq, wk=wk, bk=bk, wv=wv, bv=bv, wo=wo, bo=bo,
                w1=w1, b1=b1, w2=w2, b2=b2, w3=w3, b3=b3)


def actor_forward_ref(state, params, max_action=MAX_ACTION):
    """Pure-JAX f32 reference following the original (unfused) module exactly."""
    q = state @ params["wq"] + params["bq"]
    k = state @ params["wk"] + params["bk"]
    v = state @ params["wv"] + params["bv"]
    scores = (q @ k.T) / jnp.sqrt(jnp.float32(ATT_HIDDEN))
    attn = jax.nn.softmax(scores, axis=-1)
    att = (attn @ v) @ params["wo"] + params["bo"]
    a = jax.nn.relu(att @ params["w1"] + params["b1"])
    a = jax.nn.relu(a @ params["w2"] + params["b2"])
    return max_action * jnp.tanh(a @ params["w3"] + params["b3"])


if __name__ == "__main__":
    key = jax.random.PRNGKey(0)
    k_state, k_params = jax.random.split(key)

    N, B = 16, 8                                 # 16 independent [8, 32] states
    states = jax.random.normal(k_state, (N, B, STATE_DIM), jnp.float32)
    params = init_params(k_params)
    fused = fuse_params(params)                  # one-time host-side fusion (re-run after updates)

    # Batched path: grid over groups, weights VMEM-resident.
    out = actor_forward_batched(states, fused, groups_per_step=4)
    out = jax.block_until_ready(out)
    assert out.shape == (N, B, ACTION_DIM)

    ref = jax.vmap(lambda s: actor_forward_ref(s, params))(states)
    # Tolerance accounts for the bf16 weight quantization (the structural
    # fusions and padding are exact).
    assert jnp.allclose(out, ref, atol=5e-2, rtol=5e-2), (
        f"mismatch vs reference, max abs err = {jnp.max(jnp.abs(out - ref))}")

    # Single-call path (original module signature).
    out1 = jax.block_until_ready(actor_forward(states[0], fused))
    assert out1.shape == (B, ACTION_DIM)
    assert jnp.allclose(out1, actor_forward_ref(states[0], params),
                        atol=5e-2, rtol=5e-2), "single-call mismatch"

    print("KERNEL_OK")
</pallas_src>

<mosaic_0001>
module attributes {stable_mosaic.version = 11 : i64} {
  func.func @_actor_kernel(%arg0: i32, %arg1: memref<4x8x32xf32, #tpu.memory_space<vmem>>, %arg2: memref<32x384xbf16, #tpu.memory_space<vmem>>, %arg3: memref<1x384xf32, #tpu.memory_space<vmem>>, %arg4: memref<128x512xbf16, #tpu.memory_space<vmem>>, %arg5: memref<1x512xf32, #tpu.memory_space<vmem>>, %arg6: memref<512x384xbf16, #tpu.memory_space<vmem>>, %arg7: memref<1x384xf32, #tpu.memory_space<vmem>>, %arg8: memref<384x128xbf16, #tpu.memory_space<vmem>>, %arg9: memref<1x128xf32, #tpu.memory_space<vmem>>, %arg10: memref<4x8x128xf32, #tpu.memory_space<vmem>>) attributes {dimension_semantics = [#tpu.dimension_semantics<parallel>], iteration_bounds = array<i64: 4>, scalar_prefetch = 0 : i64, scratch_operands = 0 : i64, tpu.core_type = #tpu.core_type<tc>, window_params = [{transform_indices = @transform_0, window_bounds = array<i64: 4, 8, 32>}, {pipeline_mode = #tpu.pipeline_mode<synchronous>, transform_indices = @transform_1, window_bounds = array<i64: 32, 384>}, {pipeline_mode = #tpu.pipeline_mode<synchronous>, transform_indices = @transform_2, window_bounds = array<i64: 1, 384>}, {pipeline_mode = #tpu.pipeline_mode<synchronous>, transform_indices = @transform_3, window_bounds = array<i64: 128, 512>}, {pipeline_mode = #tpu.pipeline_mode<synchronous>, transform_indices = @transform_4, window_bounds = array<i64: 1, 512>}, {pipeline_mode = #tpu.pipeline_mode<synchronous>, transform_indices = @transform_5, window_bounds = array<i64: 512, 384>}, {pipeline_mode = #tpu.pipeline_mode<synchronous>, transform_indices = @transform_6, window_bounds = array<i64: 1, 384>}, {pipeline_mode = #tpu.pipeline_mode<synchronous>, transform_indices = @transform_7, window_bounds = array<i64: 384, 128>}, {pipeline_mode = #tpu.pipeline_mode<synchronous>, transform_indices = @transform_8, window_bounds = array<i64: 1, 128>}, {transform_indices = @transform_9, window_bounds = array<i64: 4, 8, 128>}]} {
    %c0 = arith.constant 0 : index
    %c0_0 = arith.constant 0 : index
    %c0_1 = arith.constant 0 : index
    %0 = vector.load %arg1[%c0, %c0_0, %c0_1] : memref<4x8x32xf32, #tpu.memory_space<vmem>>, vector<4x8x32xf32>
    %1 = arith.truncf %0 : vector<4x8x32xf32> to vector<4x8x32xbf16>
    %2 = vector.shape_cast %1 : vector<4x8x32xbf16> to vector<32x32xbf16>
    %c0_2 = arith.constant 0 : index
    %c0_3 = arith.constant 0 : index
    %3 = vector.load %arg2[%c0_2, %c0_3] : memref<32x384xbf16, #tpu.memory_space<vmem>>, vector<32x384xbf16>
    %cst = arith.constant dense<0.000000e+00> : vector<32x384xf32>
    %4 = tpu.matmul %2, %3, %cst {dimension_numbers = #tpu.dot_dimension_numbers<[1], [0], [0], [1], [0, 0, 1, 1], [], []>} : vector<32x32xbf16>, vector<32x384xbf16>, vector<32x384xf32> -> vector<32x384xf32>
    %c0_4 = arith.constant 0 : index
    %c0_5 = arith.constant 0 : index
    %5 = vector.load %arg3[%c0_4, %c0_5] : memref<1x384xf32, #tpu.memory_space<vmem>>, vector<1x384xf32>
    %6 = vector.broadcast %5 : vector<1x384xf32> to vector<32x384xf32>
    %7 = arith.addf %4, %6 : vector<32x384xf32>
    %8 = vector.extract_strided_slice %7 {offsets = [0, 0], sizes = [32, 128], strides = [1, 1]} : vector<32x384xf32> to vector<32x128xf32>
    %9 = vector.shape_cast %8 : vector<32x128xf32> to vector<4x8x128xf32>
    %10 = arith.truncf %9 : vector<4x8x128xf32> to vector<4x8x128xbf16>
    %11 = vector.extract_strided_slice %7 {offsets = [0, 128], sizes = [32, 128], strides = [1, 1]} : vector<32x384xf32> to vector<32x128xf32>
    %12 = vector.shape_cast %11 : vector<32x128xf32> to vector<4x8x128xf32>
    %13 = arith.truncf %12 : vector<4x8x128xf32> to vector<4x8x128xbf16>
    %14 = vector.extract_strided_slice %7 {offsets = [0, 256], sizes = [32, 128], strides = [1, 1]} : vector<32x384xf32> to vector<32x128xf32>
    %15 = vector.shape_cast %14 : vector<32x128xf32> to vector<4x8x128xf32>
    %16 = arith.truncf %15 : vector<4x8x128xf32> to vector<4x8x128xbf16>
    "tpu.trace_start"() <{level = 10 : i32, message = "gqd,gkd->gqk"}> : () -> ()
    %cst_6 = arith.constant dense<0.000000e+00> : vector<4x8x8xf32>
    %17 = tpu.matmul %10, %13, %cst_6 {dimension_numbers = #tpu.dot_dimension_numbers<[2], [2], [1], [1], [0, 0, 0, 1, 1, 1], [0], [0]>} : vector<4x8x128xbf16>, vector<4x8x128xbf16>, vector<4x8x8xf32> -> vector<4x8x8xf32>
    "tpu.trace_stop"() : () -> ()
    %cst_7 = arith.constant dense<0xFF800000> : vector<4x8xf32>
    %18 = vector.multi_reduction <maximumf>, %17, %cst_7 [2] : vector<4x8x8xf32> to vector<4x8xf32>
    %19 = vector.shape_cast %18 : vector<4x8xf32> to vector<4x8x1xf32>
    %20 = vector.broadcast %19 : vector<4x8x1xf32> to vector<4x8x8xf32>
    %21 = arith.subf %17, %20 : vector<4x8x8xf32>
    %22 = math.exp %21 : vector<4x8x8xf32>
    %cst_8 = arith.constant dense<0.000000e+00> : vector<4x8xf32>
    %23 = vector.multi_reduction <add>, %22, %cst_8 [2] : vector<4x8x8xf32> to vector<4x8xf32>
    %24 = vector.shape_cast %23 : vector<4x8xf32> to vector<4x8x1xf32>
    %25 = vector.broadcast %24 : vector<4x8x1xf32> to vector<4x8x8xf32>
    %26 = arith.divf %22, %25 : vector<4x8x8xf32>
    %27 = arith.truncf %26 : vector<4x8x8xf32> to vector<4x8x8xbf16>
    "tpu.trace_start"() <{level = 10 : i32, message = "gqk,gkd->gqd"}> : () -> ()
    %cst_9 = arith.constant dense<0.000000e+00> : vector<4x8x128xf32>
    %28 = tpu.matmul %27, %16, %cst_9 {dimension_numbers = #tpu.dot_dimension_numbers<[2], [1], [1], [2], [0, 0, 0, 1, 1, 2], [0], [0]>} : vector<4x8x8xbf16>, vector<4x8x128xbf16>, vector<4x8x128xf32> -> vector<4x8x128xf32>
    "tpu.trace_stop"() : () -> ()
    %29 = vector.shape_cast %28 : vector<4x8x128xf32> to vector<32x128xf32>
    %30 = arith.truncf %29 : vector<32x128xf32> to vector<32x128xbf16>
    %c0_10 = arith.constant 0 : index
    %c0_11 = arith.constant 0 : index
    %31 = vector.load %arg4[%c0_10, %c0_11] : memref<128x512xbf16, #tpu.memory_space<vmem>>, vector<128x512xbf16>
    %cst_12 = arith.constant dense<0.000000e+00> : vector<32x512xf32>
    %32 = tpu.matmul %30, %31, %cst_12 {dimension_numbers = #tpu.dot_dimension_numbers<[1], [0], [0], [1], [0, 0, 1, 1], [], []>} : vector<32x128xbf16>, vector<128x512xbf16>, vector<32x512xf32> -> vector<32x512xf32>
    %c0_13 = arith.constant 0 : index
    %c0_14 = arith.constant 0 : index
    %33 = vector.load %arg5[%c0_13, %c0_14] : memref<1x512xf32, #tpu.memory_space<vmem>>, vector<1x512xf32>
    %34 = vector.broadcast %33 : vector<1x512xf32> to vector<32x512xf32>
    %35 = arith.addf %32, %34 : vector<32x512xf32>
    %cst_15 = arith.constant 0.000000e+00 : f32
    %36 = vector.broadcast %cst_15 : f32 to vector<32x512xf32>
    %37 = arith.maximumf %35, %36 : vector<32x512xf32>
    %38 = arith.truncf %37 : vector<32x512xf32> to vector<32x512xbf16>
    %c0_16 = arith.constant 0 : index
    %c0_17 = arith.constant 0 : index
    %39 = vector.load %arg6[%c0_16, %c0_17] : memref<512x384xbf16, #tpu.memory_space<vmem>>, vector<512x384xbf16>
    %cst_18 = arith.constant dense<0.000000e+00> : vector<32x384xf32>
    %40 = tpu.matmul %38, %39, %cst_18 {dimension_numbers = #tpu.dot_dimension_numbers<[1], [0], [0], [1], [0, 0, 1, 1], [], []>} : vector<32x512xbf16>, vector<512x384xbf16>, vector<32x384xf32> -> vector<32x384xf32>
    %c0_19 = arith.constant 0 : index
    %c0_20 = arith.constant 0 : index
    %41 = vector.load %arg7[%c0_19, %c0_20] : memref<1x384xf32, #tpu.memory_space<vmem>>, vector<1x384xf32>
    %42 = vector.broadcast %41 : vector<1x384xf32> to vector<32x384xf32>
    %43 = arith.addf %40, %42 : vector<32x384xf32>
    %cst_21 = arith.constant 0.000000e+00 : f32
    %44 = vector.broadcast %cst_21 : f32 to vector<32x384xf32>
    %45 = arith.maximumf %43, %44 : vector<32x384xf32>
    %46 = arith.truncf %45 : vector<32x384xf32> to vector<32x384xbf16>
    %c0_22 = arith.constant 0 : index
    %c0_23 = arith.constant 0 : index
    %47 = vector.load %arg8[%c0_22, %c0_23] : memref<384x128xbf16, #tpu.memory_space<vmem>>, vector<384x128xbf16>
    %cst_24 = arith.constant dense<0.000000e+00> : vector<32x128xf32>
    %48 = tpu.matmul %46, %47, %cst_24 {dimension_numbers = #tpu.dot_dimension_numbers<[1], [0], [0], [1], [0, 0, 1, 1], [], []>} : vector<32x384xbf16>, vector<384x128xbf16>, vector<32x128xf32> -> vector<32x128xf32>
    %c0_25 = arith.constant 0 : index
    %c0_26 = arith.constant 0 : index
    %49 = vector.load %arg9[%c0_25, %c0_26] : memref<1x128xf32, #tpu.memory_space<vmem>>, vector<1x128xf32>
    %50 = vector.broadcast %49 : vector<1x128xf32> to vector<32x128xf32>
    %51 = arith.addf %48, %50 : vector<32x128xf32>
    %52 = math.tanh %51 : vector<32x128xf32>
    %cst_27 = arith.constant 2.000000e+00 : f32
    %53 = vector.broadcast %cst_27 : f32 to vector<32x128xf32>
    %54 = arith.mulf %53, %52 : vector<32x128xf32>
    %55 = vector.shape_cast %54 : vector<32x128xf32> to vector<4x8x128xf32>
    %c0_28 = arith.constant 0 : index
    %c0_29 = arith.constant 0 : index
    %c0_30 = arith.constant 0 : index
    %56 = vector.load %arg10[%c0_28, %c0_29, %c0_30] : memref<4x8x128xf32, #tpu.memory_space<vmem>>, vector<4x8x128xf32>
    tpu.vector_store %arg10[%c0_28, %c0_29, %c0_30], %55 {strides = array<i32>} : memref<4x8x128xf32, #tpu.memory_space<vmem>>, vector<4x8x128xf32>,
    return
  }
  func.func @transform_0(%arg0: i32) -> (i32, i32, i32) {
    %c0_i32 = arith.constant 0 : i32
    %c0_i32_0 = arith.constant 0 : i32
    %c0_i32_1 = arith.constant 0 : i32
    return %arg0, %c0_i32, %c0_i32_0 : i32, i32, i32
  }
  func.func @transform_1(%arg0: i32) -> (i32, i32) {
    %c0_i32 = arith.constant 0 : i32
    %c0_i32_0 = arith.constant 0 : i32
    %c0_i32_1 = arith.constant 0 : i32
    return %c0_i32, %c0_i32_0 : i32, i32
  }
  func.func @transform_2(%arg0: i32) -> (i32, i32) {
    %c0_i32 = arith.constant 0 : i32
    %c0_i32_0 = arith.constant 0 : i32
    %c0_i32_1 = arith.constant 0 : i32
    return %c0_i32, %c0_i32_0 : i32, i32
  }
  func.func @transform_3(%arg0: i32) -> (i32, i32) {
    %c0_i32 = arith.constant 0 : i32
    %c0_i32_0 = arith.constant 0 : i32
    %c0_i32_1 = arith.constant 0 : i32
    return %c0_i32, %c0_i32_0 : i32, i32
  }
  func.func @transform_4(%arg0: i32) -> (i32, i32) {
    %c0_i32 = arith.constant 0 : i32
    %c0_i32_0 = arith.constant 0 : i32
    %c0_i32_1 = arith.constant 0 : i32
    return %c0_i32, %c0_i32_0 : i32, i32
  }
  func.func @transform_5(%arg0: i32) -> (i32, i32) {
    %c0_i32 = arith.constant 0 : i32
    %c0_i32_0 = arith.constant 0 : i32
    %c0_i32_1 = arith.constant 0 : i32
    return %c0_i32, %c0_i32_0 : i32, i32
  }
  func.func @transform_6(%arg0: i32) -> (i32, i32) {
    %c0_i32 = arith.constant 0 : i32
    %c0_i32_0 = arith.constant 0 : i32
    %c0_i32_1 = arith.constant 0 : i32
    return %c0_i32, %c0_i32_0 : i32, i32
  }
  func.func @transform_7(%arg0: i32) -> (i32, i32) {
    %c0_i32 = arith.constant 0 : i32
    %c0_i32_0 = arith.constant 0 : i32
    %c0_i32_1 = arith.constant 0 : i32
    return %c0_i32, %c0_i32_0 : i32, i32
  }
  func.func @transform_8(%arg0: i32) -> (i32, i32) {
    %c0_i32 = arith.constant 0 : i32
    %c0_i32_0 = arith.constant 0 : i32
    %c0_i32_1 = arith.constant 0 : i32
    return %c0_i32, %c0_i32_0 : i32, i32
  }
  func.func @transform_9(%arg0: i32) -> (i32, i32, i32) {
    %c0_i32 = arith.constant 0 : i32
    %c0_i32_0 = arith.constant 0 : i32
    %c0_i32_1 = arith.constant 0 : i32
    return %arg0, %c0_i32, %c0_i32_0 : i32, i32, i32
  }
}

</mosaic_0001>

<bundles_post_ra>
// kernel: tpu_custom_call.1
= control target key start
LH: loop header
LB: loop body
LE: loop exit
PB: predicated region body
PF: predicated region fallthrough
CT: control target
= control target key end

     0   :  { %s3972_s0 = inlined_call_operand.hbm [shape: f32[16,8,32], index: 0, kind: input, shape index: {}]   ;;  %s3973_s1 = inlined_call_operand.hbm [shape: bf16[32,384], index: 1, kind: input, shape index: {}]   ;;  %s3974_s2 = inlined_call_operand.vmem [shape: f32[1,384], index: 2, kind: input, shape index: {}]   ;;  %s3975_s3 = inlined_call_operand.hbm [shape: bf16[128,512], index: 3, kind: input, shape index: {}]   ;;  %s3976_s4 = inlined_call_operand.vmem [shape: f32[1,512], index: 4, kind: input, shape index: {}]   ;;  %s3977_s5 = inlined_call_operand.hbm [shape: bf16[512,384], index: 5, kind: input, shape index: {}]   ;;  %s3978_s6 = inlined_call_operand.vmem [shape: f32[1,384], index: 6, kind: input, shape index: {}]   ;;  %s3979_s7 = inlined_call_operand.hbm [shape: bf16[384,128], index: 7, kind: input, shape index: {}]   ;;  %s3980_s8 = inlined_call_operand.vmem [shape: f32[1,128], index: 8, kind: input, shape index: {}]   ;;  %s3981_s9 = inlined_call_operand.hbm [shape: f32[16,8,128], index: 9, kind: output, shape index: {}]  }
   0x1   :  { %3986 = sst [smem:[#allocation16_spill]] %s3973_s1 }
   0x2   :  { %3987 = sst [smem:[#allocation17_spill]] %s3975_s3 }
   0x3   :  { %3988 = sst [smem:[#allocation18_spill]] %s3977_s5 }
   0x4   :  { %14 = vsyncpa [#allocation3], 0 }
   0x5   :  { %16 = vsyncpa [#allocation3 + $0x1], 0 }
   0x6   :  { %17 = vsyncpa [#allocation6], 0 }
   0x7   :  { %18 = vsyncpa [#allocation9], 0 }
   0x8   :  { %19 = vsyncpa [#allocation4], 0 }
   0x9   :  { %21 = vsyncpa [#allocation4 + $0x1], 0  ;;  %s3653_s30 = smov 0   ;;  %s3655_s10 = smov 0  }
   0xa   :  { %s3657_s11 = smov 0   ;;  %s3659_s12 = smov 0  }
   0xb LB: > { %s3674_s13 = sadd.s32 4294967295, %s3582_s12   ;;  %s2661_s14 = sadd.s32 4294967294, %s3582_s12   ;;  %s3582_s12 = sphi %s3659_s12, %s4010_s12   ;;  %s3578_s11 = sphi %s3657_s11, %s4009_s11   ;;  %s3574_s10 = sphi %s3655_s10, %s4008_s10   ;;  %s3570_s30 = sphi %s3653_s30, %s4007_s30  }
   0xc   : > { %p47_p0 = scmp.ne.s32.totalorder %s3574_s10, %s3570_s30  ;;  %p3982_p1 = scmp.eq.s32.totalorder %s3674_s13, 0 }
   0xd   : > { %p245_p3 = scmp.eq.s32.totalorder %s2661_s14, 3  ;;  %p2662_p5 = scmp.ge.s32.totalorder %s3582_s12, 1 }
   0xe   : > { %p3683_p4 = por %p3982_p1, %p47_p0  ;;  %p252_p7 = scmp.lt.s32.totalorder %s3582_s12, 5 }
   0xf   : > { %p3688_p6 = por %p245_p3, %p47_p0  ;;  %s3584_s18 = smov [#allocation5]  }
  0x10   : > { %s3989_s15 = scalar_select %p3683_p4, 1, 0 }
  0x11   : > { %s3990_s16 = scalar_select %p3688_p6, 1, 0 }
  0x12   : > { %p3693_p8 = pnand %p2662_p5, %p252_p7  ;;  %s264_s19 = sshll.u32 %s3584_s18, 4  ;;  %s265_s19 = int_to_ptr.vmem [resolvable:$true] %s264_s19 }
  0x13   : > { %s3585_s21 = smov [#allocation8]   ;;  %s3586_s23 = smov [#allocation7]  }
  0x14   : > { %s3991_s17 = scalar_select %p3693_p8, 1, 0 }
  0x15   : > { %p3066_p9 = pneg %p3693_p8  ;;  %s296_s22 = sshll.u32 %s3585_s21, 4  ;;  %s297_s22 = int_to_ptr.vmem [resolvable:$true] %s296_s22 }
  0x16   : > { %s280_s24 = sshll.u32 %s3586_s23, 4  ;;  %s3389_s25 = scalar_lea.vmem %s265_s19, 768  ;;  %s281_s24 = int_to_ptr.vmem [resolvable:$true] %s280_s24 }
  0x17   : > { %p3701_p10 = pnand %p3066_p9, %p3982_p1  ;;  %p3390_p12 = scmp.ne.s32.totalorder %s265_s19, %s3389_s25 }
  0x18   : > { %p3397_p3 = scmp.lt.s32.totalorder %s265_s19, %s265_s19  ;;  %p3398_p5 = scmp.lt.s32.totalorder %s3389_s25, %s3389_s25 }
  0x19   : > { %p3380_p11 = pneg %p3701_p10 }
  0x1a   : > { %p3399_p7 = por %p3398_p5, %p3397_p3 }
  0x1b   : > { %p3392_p13 = pnand %p3390_p12, %p3380_p11 }
  0x1d   : > { %p3393_p0 = pneg %p3392_p13 }
  0x1f   : > { %p3400_p9 = pnand %p3399_p7, %p3393_p0 }
  0x21   : > { %3403 = shalt.err (!%p3400_p9)
}
  0x22   : > { %s3587_s26 = smov 192   ;;  %s3588_s27 = smov 12  }
  0x23   : > { %s3993_s1 = sld [smem:[#allocation16_spill]]  ;;  %s3415_s14 = scalar_lea.vmem %s297_s22, 12288 }
  0x24   : > { %p3416_p1 = scmp.ne.s32.totalorder %s297_s22, %s3415_s14  ;;  %p3423_p2 = scmp.lt.s32.totalorder %s297_s22, %s297_s22 }
  0x25   : > { %p3424_p6 = scmp.lt.s32.totalorder %s3415_s14, %s3415_s14 }
  0x26   : > { %p3418_p12 = pnand %p3416_p1, %p3380_p11 }
  0x27   : > { %p3425_p3 = por %p3424_p6, %p3423_p2 }
  0x28   : > { %p3419_p13 = pneg %p3418_p12 }
  0x29   : > { %3069 = dma.hbm_to_vmem [thread:$0]  (!%p3701_p10), %s3993_s1, 768, %s265_s19, [#allocation6], %s3587_s26, %s3587_s26, %s3588_s27  }
  0x2a   : > { %p3426_p0 = pnand %p3425_p3, %p3419_p13 }
  0x2c   : > { %3429 = shalt.err (!%p3426_p0)
}
  0x2d   : > { %s3994_s5 = sld [smem:[#allocation18_spill]]  ;;  %s3441_s19 = scalar_lea.vmem %s281_s24, 4096 }
  0x2e   : > { %p3442_p5 = scmp.ne.s32.totalorder %s281_s24, %s3441_s19  ;;  %p3449_p9 = scmp.lt.s32.totalorder %s281_s24, %s281_s24 }
  0x2f   : > { %p3450_p12 = scmp.lt.s32.totalorder %s3441_s19, %s3441_s19 }
  0x30   : > { %p3444_p7 = pnand %p3442_p5, %p3380_p11 }
  0x31   : > { %p3451_p4 = por %p3450_p12, %p3449_p9 }
  0x32   : > { %p3445_p1 = pneg %p3444_p7 }
  0x33   : > { %3075 = dma.hbm_to_vmem [thread:$0]  (!%p3701_p10), %s3994_s5, 12288, %s297_s22, [#allocation9], %s3587_s26, %s3587_s26, %s3588_s27  }
  0x34   : > { %p3452_p2 = pnand %p3451_p4, %p3445_p1 }
  0x36   : > { %3455 = shalt.err (!%p3452_p2)
}
  0x37   : > { %s3589_s23 = smov 256   ;;  %s3590_s25 = smov 16  }
  0x38   : > { %s3995_s3 = sld [smem:[#allocation17_spill]]  ;;  %s3591_s22 = smov [#allocation10]  }
  0x39   : > { %s312_s26 = sshll.u32 %s3591_s22, 4  ;;  %s313_s26 = int_to_ptr.vmem [resolvable:$true] %s312_s26 }
  0x3a   : > { %s3467_s27 = scalar_lea.vmem %s313_s26, 3072  ;;  %p3475_p4 = scmp.lt.s32.totalorder %s313_s26, %s313_s26 }
  0x3b   : > { %p3468_p6 = scmp.ne.s32.totalorder %s313_s26, %s3467_s27  ;;  %p3476_p0 = scmp.lt.s32.totalorder %s3467_s27, %s3467_s27 }
  0x3d   : > { %p3470_p13 = pnand %p3468_p6, %p3380_p11  ;;  %p3477_p5 = por %p3476_p0, %p3475_p4 }
  0x3e   : > { %3072 = dma.hbm_to_vmem [thread:$0]  (!%p3701_p10), %s3995_s3, 4096, %s281_s24, [#allocation6], %s3589_s23, %s3589_s23, %s3590_s25  }
  0x3f   : > { %p3471_p3 = pneg %p3470_p13 }
  0x41   : > { %p3478_p7 = pnand %p3477_p5, %p3471_p3 }
  0x43   : > { %3481 = shalt.err (!%p3478_p7)
}
  0x44   : > { %s3592_s14 = smov 64   ;;  %s3593_s24 = smov 4  }
  0x45   : > { %3078 = dma.hbm_to_vmem [thread:$0]  (!%p3701_p10), %s3979_s7, 3072, %s313_s26, [#allocation9], %s3592_s14, %s3592_s14, %s3593_s24  }
  0x46   : > { %s3740_s19 = sadd.s32 1, %s3582_s12   ;;  %s34_s25 = sadd.s32 1, %s3578_s11 }
  0x47   : > { %s31_s23 = ssub.s32 %s3582_s12, %s3740_s19  ;;  %p41_p1 = scmp.ne.s32.totalorder %s3578_s11, %s3574_s10 }
  0x48   : > { %p32_p11 = scmp.eq.s32.totalorder %s31_s23, 0  ;;  %p42_p9 = scmp.eq.s32.totalorder %s3582_s12, 0 }
  0x49   : > { %p3996_p2 = scmp.eq.s32.totalorder %s3674_s13, 3  ;;  %p3091_p13 = scmp.lt.s32.totalorder %s3582_s12, 4 }
  0x4a   : > { %s3749_s28 = scalar_select %p32_p11, %s3578_s11, %s34_s25  }
  0x4b   : > { %p43_p12 = por %p42_p9, %p41_p1  ;;  %p3753_p6 = por %p3996_p2, %p41_p1 }
  0x4c   : > { %s329_s20 = sand.u32 1, %s3578_s11   ;;  %s2852_s26 = sshll.u32 %s3582_s12, 9 }
  0x4d   : > { %s3997_s29 = scalar_select %p3753_p6, 1, 0 }
  0x4e   : > { %s2668_s22 = sshll.u32 %s329_s20, 5  ;;  %s3763_s24 = scalar_lea.hbm %s3972_s0, %s2852_s26 }
  0x4f   : > { %s333_s18 = scalar_lea.vmem [#allocation2], %s2668_s22  ;;  %p3767_p10 = pnand %p3091_p13, %p43_p12 }
  0x50   : > { %s340_s21 = sshll.u32 %s333_s18, 4  ;;  %s3771_s25 = scalar_lea.sflag [#allocation3], %s329_s20  ;;  %s3765_s21 = int_to_ptr.vmem [resolvable:$true] %s340_s21 }
  0x51   : > { %s3482_s1 = scalar_lea.hbm %s3763_s24, 512  ;;  %p3484_p4 = pneg %p3767_p10 }
  0x52   : > { %p3483_p3 = scmp.ne.s32.totalorder %s3763_s24, %s3482_s1  ;;  %s3487_s22 = scalar_lea.hbm %s3972_s0, 2048 }
  0x53   : > { %p3488_p7 = scmp.lt.s32.totalorder %s3763_s24, %s3972_s0  ;;  %p3489_p11 = scmp.lt.s32.totalorder %s3487_s22, %s3482_s1 }
  0x54   : > { %p3485_p0 = pnand %p3484_p4, %p3483_p3 }
  0x55   : > { %p3490_p1 = por %p3489_p11, %p3488_p7 }
  0x56   : > { %p3486_p5 = pneg %p3485_p0 }
  0x58   : > { %p3491_p9 = pnand %p3490_p1, %p3486_p5 }
  0x5a   : > { %3494 = shalt.err (!%p3491_p9)
}
  0x5b   : > { %s3495_s20 = scalar_lea.vmem %s3765_s21, 512  ;;  %s3594_s3 = smov [#allocation2]  }
  0x5c   : > { %p3496_p12 = scmp.ne.s32.totalorder %s3765_s21, %s3495_s20  ;;  %s3500_s5 = sshll.u32 %s3594_s3, 4  ;;  %s3501_s5 = int_to_ptr.vmem [resolvable:$false] %s3500_s5 }
  0x5d   : > { %s3502_s26 = scalar_lea.vmem %s3501_s5, 1024  ;;  %p3503_p3 = scmp.lt.s32.totalorder %s3765_s21, %s3501_s5 }
  0x5e   : > { %p3498_p2 = pnand %p3496_p12, %p3484_p4  ;;  %p3504_p0 = scmp.lt.s32.totalorder %s3502_s26, %s3495_s20 }
  0x60   : > { %p3499_p13 = pneg %p3498_p2  ;;  %p3505_p6 = por %p3504_p0, %p3503_p3 }
  0x62   : > { %p3506_p8 = pnand %p3505_p6, %p3499_p13 }
  0x64   : > { %3509 = shalt.err (!%p3506_p8)
}
  0x65   : > { %s3595_s1 = smov 128   ;;  %s3596_s27 = smov 8  }
  0x66   : > { %3082 = dma.hbm_to_vmem [thread:$0]  (!%p3767_p10), %s3763_s24, 512, %s3765_s21, %s3771_s25, %s3595_s1, %s3595_s1, %s3596_s27  }
  0x67   : > { %p3999_p4 = scmp.ne.s32.totalorder %s3991_s17, 0 }
  0x68   : > { %s3795_s3 = sand.u32 (!%p3999_p4), 1, %s3574_s10   ;;  %p4000_p8 = scmp.ne.s32.totalorder (!%p3999_p4), %s3989_s15, 0 }
  0x69   : > { %352 = sbr.rel (%p3999_p4) target bundleno = 1724 (0x6bc), region = 56  ;;  %s2672_s5 = sshll.u32 (!%p3999_p4), %s3795_s3, 5 }
  0x6a   : > { %s355_s22 = scalar_lea.sflag (!%p3999_p4), [#allocation3], %s3795_s3  ;;  %s358_s14 = scalar_lea.vmem (!%p3999_p4), [#allocation2], %s2672_s5 }
  0x6e   : > { %3553 = dma.done.wait (%p4000_p8), %s355_s22, 512  }
  0x6f   : > { %3555 = vsyncadd (%p4000_p8), %s355_s22, 4294966784  ;;  %p4001_p6 = scmp.eq.s32.totalorder %s3674_s13, 0 }
  0x71   : > { %3557 = dma.done.wait (%p4001_p6), [#allocation6], 4864   ;;  %p4002_p10 = pmov %p4001_p6 }
  0x72   : > { %p4003_p5 = pmov %p4001_p6 }
  0x73   : > { %3559 = vsyncadd (%p4002_p10), [#allocation6], 4294962432 }
  0x74   : > { %3561 = dma.done.wait (%p4003_p5), [#allocation9], 15360   ;;  %p4004_p7 = pmov %p4003_p5 }
  0x75   : > { %v3597_v0 = vmov 0   ;;  %v3146_v1 = vld [vmem:[#allocation5 + $0x1c] ss:$12 sps:$4 sm:$0xff]   ;;  %v3148_v2 = vld [vmem:[#allocation5 + $0x18] ss:$12 sps:$4 sm:$0xff]   ;;  %vm487_vm0 = vcmask 261120   ;;  %v430_v14 = vlaneseq }
  0x76   : > { %3563 = vsyncadd (%p4004_p7), [#allocation9], 4294951936  ;;  %526 = vmatprep.mubr.bf16.mxu0 %v3597_v0  ;;  %506 = vmatprep.subr.bf16.mxu0 %v3146_v1  ;;  %v3149_v3 = vld [vmem:[#allocation5 + $0x4] ss:$12 sps:$4 sm:$0xff]   ;;  %v3151_v5 = vld [vmem:[#allocation5] ss:$12 sps:$4 sm:$0xff]  }
  0x77   : > { %v412_v4 = vld [vmem:[%s358_s14] sm:$0xff]  ;;  %507 = vmatpush1.bf16.msra.mxu0 %v3148_v2  ;;  %v413_v6 = vld [vmem:[%s358_s14 + $0x8] sm:$0xff]  ;;  %v414_v9 = vld [vmem:[%s358_s14 + $0x10] sm:$0xff]  ;;  %v3598_v13 = vmov 0.0   ;;  %vm3599_vm1 = vmmov 0   ;;  %v3821_v15 = vshrl.u32 %v430_v14, 7 }
  0x78   : > { %508 = vmatprep.subr.bf16.mxu0 %v3149_v3  ;;  %v2853_v7 = vpack.c.bf16 %v413_v6, %v412_v4  ;;  %v3152_v8 = vld [vmem:[#allocation5 + $0x20] ss:$12 sps:$4 sm:$0xff]   ;;  %v415_v10 = vld [vmem:[%s358_s14 + $0x18] sm:$0xff]  ;;  %v3153_v12 = vld [vmem:[#allocation5 + $0x8] ss:$12 sps:$4 sm:$0xff]   ;;  %vm820_vm2 = vcmask 1043456  }
  0x79   : > { %2970 = vmatprep.subr.bf16.mxu1 %v3152_v8  ;;  %v2854_v11 = vpack.c.bf16 %v415_v10, %v414_v9  ;;  %v3824_v16 = vsub.s32 1, %v3821_v15  ;;  %v428_v17 = vld [vmem:[%s3974_s2] sm:$0x7]  ;;  %v3831_v19 = vsub.s32 0, %v3821_v15  ;;  %v3847_v45 = vsub.s32 2, %v3821_v15  ;;  %s408_s26 = scalar_lea.vmem [#allocation11], %s2672_s5 }
  0x7a   : > { %2974 = vmatprep.mubr.msk.bf16.mxu1 %vm487_vm0, %v2853_v7  ;;  %2971 = vmatpush3.bf16.msra.mxu1 %v3152_v8  ;;  %vm768_vm3 = vcmask 64512   ;;  %s2550_s1 = sshll.u32 %s408_s26, 4  ;;  %s2855_s27 = sshll.u32 %s3674_s13, 9  ;;  %s3925_s1 = int_to_ptr.vmem [resolvable:$true] %s2550_s1 }
  0x7b   : > { %509 = vmatpush1.bf16.msra.mxu0 %v3151_v5  ;;  %2972 = vmatprep.subr.bf16.mxu1 %v3153_v12  ;;  %v437_v18 = vrot.slane %v428_v17, %v3824_v16  ;;  %v433_v23 = vrot.slane %v428_v17, %v3831_v19  ;;  %v441_v46 = vrot.slane %v428_v17, %v3847_v45  ;;  %s3930_s15 = scalar_lea.hbm %s3981_s9, %s2855_s27  ;;  %s2537_s5 = scalar_lea.sflag [#allocation4], %s3795_s3 }
  0x7c   : > { %2984 = vmatprep.subr.bf16.mxu0 %v3598_v13  ;;  %s3510_s17 = scalar_lea.vmem %s3925_s1, 512  ;;  %p4005_p1 = scmp.ne.s32.totalorder %s3997_s29, 0 }
  0x7d   : > { %p3511_p11 = scmp.ne.s32.totalorder %s3925_s1, %s3510_s17  ;;  %s3600_s13 = smov [#allocation11]  }
  0x7e   : > { %2686 = vmatmul.mubr.msk.bf16.vlgmr.msra.gmra.mxu0 %vm487_vm0, %v2853_v7  ;;  %2973 = vmatpush3.bf16.msra.mxu1 %v3153_v12  ;;  %s3514_s24 = sshll.u32 %s3600_s13, 4  ;;  %s3515_s24 = int_to_ptr.vmem [resolvable:$false] %s3514_s24 }
  0x7f   : > { %536 = vmatprep.mubr.bf16.mxu0 %v3597_v0  ;;  %2978 = vmatprep.subr.bf16.mxu1 %v3598_v13  ;;  %p3512_p9 = pnand %p3511_p11, %p4005_p1  ;;  %s3516_s21 = scalar_lea.vmem %s3515_s24, 1024 }
  0x80   : > { %p3517_p2 = scmp.lt.s32.totalorder %s3925_s1, %s3515_s24  ;;  %p3518_p13 = scmp.lt.s32.totalorder %s3516_s21, %s3510_s17 }
  0x81   : > { %2975 = vmatmul.mubr.msk.bf16.vlgmr.msra.gmra.mxu1 %vm487_vm0, %v2854_v11  ;;  %p3513_p12 = pneg %p3512_p9 }
  0x82   : > { %2980 = vmatprep.mubr.msk.bf16.mxu1 %vm3599_vm1, %v3598_v13  ;;  %p3519_p3 = por %p3518_p13, %p3517_p2 }
  0x84   : > { %p3520_p0 = pnand %p3519_p3, %p3513_p12 }
  0x86   : > { %2687 = vmatmul.mubr.msk.bf16.gmra.mxu0 %vm487_vm0, %v2854_v11 }
  0x87   : > { %2986 = vmatprep.mubr.msk.bf16.mxu0 %vm3599_vm1, %v3598_v13 }
 0x13e   : > { %v528_v20 = vpop.f32.mrf.mxu0 }
 0x13f   : > { %v529_v28 = vadd.f32 %v528_v20, %v433_v23 }
 0x140   : > { %v530_v21 = vpop.f32.mrf.mxu0 }
 0x141   : > { %v531_v22 = vadd.f32 %v530_v21, %v437_v18  ;;  %v596_v33 = vpack.c.bf16 %v529_v28, %v529_v28  ;;  %v2976_v47 = vpop.f32.mrf.mxu1 }
 0x142   : > { %v532_v24 = vpop.f32.mrf.mxu0  ;;  %v590_v48 = vadd.f32 %v2976_v47, %v441_v46 }
 0x143   : > { %v600_v25 = vpack.c.bf16 %v531_v22, %v531_v22  ;;  %v533_v34 = vadd.f32 %v532_v24, %v433_v23  ;;  %v581_v49 = vpop.f32.mrf.mxu1 }
 0x144   : > { %v534_v26 = vpop.f32.mrf.mxu0  ;;  %v606_v50 = vpack.c.bf16 %v590_v48, %v590_v48  ;;  %v582_v51 = vadd.f32 %v581_v49, %v441_v46 }
 0x145   : > { %v535_v27 = vadd.f32 %v534_v26, %v437_v18  ;;  %2979 = vmatpush3.bf16.xpose.msra.mxu1 %v600_v25  ;;  %v597_v40 = vpack.c.bf16 %v533_v34, %v533_v34  ;;  %v2977_v52 = vpop.f32.mrf.mxu1 }
 0x146   : > { %v538_v29 = vpop.f32.mrf.mxu0  ;;  %2990 = vmatprep.subr.bf16.mxu1 %v3598_v13  ;;  %v3851_v53 = vsel %vm820_vm2, %v606_v50, 0  ;;  %v604_v54 = vpack.c.bf16 %v582_v51, %v582_v51  ;;  %v593_v55 = vadd.f32 %v2977_v52, %v441_v46  ;;  %v3156_v52 = vld [vmem:[#allocation7 + $0xe4] ss:$16 sps:$4 sm:$0xff]  }
 0x147   : > { %v601_v30 = vpack.c.bf16 %v535_v27, %v535_v27  ;;  %v539_v37 = vadd.f32 %v538_v29, %v433_v23  ;;  %v584_v56 = vpop.f32.mrf.mxu1 }
 0x148   : > { %v540_v31 = vpop.f32.mrf.mxu0  ;;  %v822_v57 = vsel %vm820_vm2, %v604_v54, 0  ;;  %v607_v58 = vpack.c.bf16 %v593_v55, %v593_v55  ;;  %v585_v59 = vadd.f32 %v584_v56, %v441_v46 }
 0x149   : > { %v541_v32 = vadd.f32 %v540_v31, %v437_v18  ;;  %2985 = vmatpush3.bf16.xpose.msra.mxu0 %v601_v30  ;;  %v598_v42 = vpack.c.bf16 %v539_v37, %v539_v37 }
 0x14a   : > { %v542_v35 = vpop.f32.mrf.mxu0  ;;  %2996 = vmatprep.subr.bf16.mxu0 %v3598_v13  ;;  %v3855_v60 = vsel %vm820_vm2, %v607_v58, 0  ;;  %v605_v61 = vpack.c.bf16 %v585_v59, %v585_v59 }
 0x14b   : > { %v602_v36 = vpack.c.bf16 %v541_v32, %v541_v32  ;;  %v543_v43 = vadd.f32 %v542_v35, %v433_v23 }
 0x14c   : > { %v544_v38 = vpop.f32.mrf.mxu0  ;;  %2981 = vmatmul.mubr.bf16.vlgmr.msra.gmra.mxu1 %v596_v33  ;;  %v868_v62 = vsel %vm820_vm2, %v605_v61, 0  ;;  %v3154_v61 = vld [vmem:[#allocation7 + $0xe0] ss:$16 sps:$4 sm:$0xff]  }
 0x14d   : > { %v545_v39 = vadd.f32 %v544_v38, %v437_v18  ;;  %2991 = vmatpush3.bf16.xpose.msra.mxu1 %v602_v36  ;;  %2992 = vmatprep.mubr.msk.bf16.mxu1 %vm3599_vm1, %v3598_v13  ;;  %v599_v44 = vpack.c.bf16 %v543_v43, %v543_v43 }
 0x14e   : > { %3002 = vmatprep.subr.bf16.mxu1 %v3598_v13 }
 0x14f   : > { %v603_v41 = vpack.c.bf16 %v545_v39, %v545_v39 }
 0x150   : > { %2987 = vmatmul.mubr.bf16.vlgmr.msra.gmra.mxu0 %v597_v40 }
 0x151   : > { %2997 = vmatpush3.bf16.xpose.msra.mxu0 %v603_v41  ;;  %2998 = vmatprep.mubr.msk.bf16.mxu0 %vm3599_vm1, %v3598_v13 }
 0x152   : > { %3008 = vmatprep.subr.bf16.mxu0 %v3598_v13 }
 0x154   : > { %2993 = vmatmul.mubr.bf16.vlgmr.msra.gmra.mxu1 %v598_v42 }
 0x155   : > { %3004 = vmatprep.mubr.msk.bf16.mxu1 %vm3599_vm1, %v3598_v13  ;;  %3003 = vmatpush3.bf16.msra.mxu1 %v822_v57  ;;  %v3159_v57 = vld [vmem:[#allocation7 + $0xec] ss:$16 sps:$4 sm:$0xff]  }
 0x156   : > { %3014 = vmatprep.subr.bf16.mxu1 %v3598_v13 }
 0x158   : > { %2999 = vmatmul.mubr.bf16.vlgmr.msra.gmra.mxu0 %v599_v44 }
 0x159   : > { %3010 = vmatprep.mubr.msk.bf16.mxu0 %vm3599_vm1, %v3598_v13  ;;  %3009 = vmatpush3.bf16.msra.mxu0 %v868_v62 }
 0x15a   : > { %3020 = vmatprep.subr.bf16.mxu0 %v3598_v13 }
 0x20c   : > { %v642_v63 = vpop.f32.mrf.mxu1 }
 0x20d   : > { %v769_v1 = vsel %vm768_vm3, %v642_v63, -inf }
 0x20e   : > { %770 = vmax.xlane.f32.xlu0 %v769_v1  ;;  %v2982_v2 = vpop.f32.mrf.mxu1 }
 0x20f   : > { %v3157_v2 = vld [vmem:[#allocation7 + $0xe8] ss:$16 sps:$4 sm:$0xff]  }
 0x210   : > { %v645_v3 = vpop.f32.mrf.mxu1  ;;  %v682_v4 = vpop.f32.mrf.mxu0 }
 0x211   : > { %v772_v5 = vsel %vm768_vm3, %v682_v4, -inf  ;;  %v3160_v3 = vld [vmem:[#allocation7 + $0xc0] ss:$16 sps:$4 sm:$0xff]  }
 0x212   : > { %v2988_v6 = vpop.f32.mrf.mxu0  ;;  %773 = vmax.xlane.f32.xlu0 %v772_v5  ;;  %v2983_v7 = vpop.f32.mrf.mxu1  ;;  %v3165_v5 = vld [vmem:[#allocation7 + $0xcc] ss:$16 sps:$4 sm:$0xff]  }
 0x213   : > { %v3166_v6 = vld [vmem:[#allocation7 + $0xa0] ss:$16 sps:$4 sm:$0xff]   ;;  %v3171_v7 = vld [vmem:[#allocation7 + $0xac] ss:$16 sps:$4 sm:$0xff]  }
 0x214   : > { %v685_v8 = vpop.f32.mrf.mxu0  ;;  %v722_v9 = vpop.f32.mrf.mxu1 }
 0x215   : > { %v775_v10 = vsel %vm768_vm3, %v722_v9, -inf  ;;  %v3174_v8 = vld [vmem:[#allocation7 + $0x84] ss:$16 sps:$4 sm:$0xff]  }
 0x216   : > { %v2989_v11 = vpop.f32.mrf.mxu0  ;;  %776 = vmax.xlane.f32.xlu1 %v775_v10  ;;  %v2994_v12 = vpop.f32.mrf.mxu1  ;;  %v3172_v10 = vld [vmem:[#allocation7 + $0x80] ss:$16 sps:$4 sm:$0xff]  }
 0x217   : > { %v3177_v11 = vld [vmem:[#allocation7 + $0x8c] ss:$16 sps:$4 sm:$0xff]   ;;  %v3180_v12 = vld [vmem:[#allocation7 + $0x64] ss:$16 sps:$4 sm:$0xff]  }
 0x218   : > { %v762_v14 = vpop.f32.mrf.mxu0  ;;  %v725_v17 = vpop.f32.mrf.mxu1 }
 0x219   : > { %v778_v18 = vsel %vm768_vm3, %v762_v14, -inf  ;;  %v3178_v17 = vld [vmem:[#allocation7 + $0x60] ss:$16 sps:$4 sm:$0xff]  }
 0x21a   : > { %779 = vmax.xlane.f32.xlu1 %v778_v18  ;;  %v3000_v20 = vpop.f32.mrf.mxu0  ;;  %v2995_v21 = vpop.f32.mrf.mxu1  ;;  %v3183_v18 = vld [vmem:[#allocation7 + $0x6c] ss:$16 sps:$4 sm:$0xff]  }
 0x21b   : > { %v3186_v20 = vld [vmem:[#allocation7 + $0x44] ss:$16 sps:$4 sm:$0xff]   ;;  %v3181_v21 = vld [vmem:[#allocation7 + $0x68] ss:$16 sps:$4 sm:$0xff]  }
 0x21c   : > { %v765_v22 = vpop.f32.mrf.mxu0 }
 0x21d   : > { %v3184_v22 = vld [vmem:[#allocation7 + $0x40] ss:$16 sps:$4 sm:$0xff]  }
 0x21e   : > { %v3001_v23 = vpop.f32.mrf.mxu0 }
 0x21f   : > { %v3189_v23 = vld [vmem:[#allocation7 + $0x4c] ss:$16 sps:$4 sm:$0xff]  }
 0x297   : > { %v771_v24 = vpop.xlane.xlu0 %770 }
 0x298   : > { %v781_v25 = vsub.f32 %v642_v63, %v771_v24  ;;  %v3162_v63 = vld [vmem:[#allocation7 + $0xc4] ss:$16 sps:$4 sm:$0xff]  }
 0x299   : > { %v3192_v24 = vld [vmem:[#allocation7 + $0x24] ss:$16 sps:$4 sm:$0xff]  }
 0x29a   : > { %v785_v26 = vmul.f32 1.442695, %v781_v25  ;;  %v3187_v25 = vld [vmem:[#allocation7 + $0x48] ss:$16 sps:$4 sm:$0xff]  }
 0x29b   : > { %v774_v27 = vpop.xlane.xlu0 %773 }
 0x29c   : > { %3354 = vpow2.f32 %v785_v26  ;;  %v782_v28 = vsub.f32 %v682_v4, %v774_v27  ;;  %v3190_v26 = vld [vmem:[#allocation7 + $0x20] ss:$16 sps:$4 sm:$0xff]   ;;  %v3195_v27 = vld [vmem:[#allocation7 + $0x2c] ss:$16 sps:$4 sm:$0xff]  }
 0x29e   : > { %v787_v29 = vmul.f32 1.442695, %v782_v28  ;;  %v3193_v28 = vld [vmem:[#allocation7 + $0x28] ss:$16 sps:$4 sm:$0xff]  }
 0x29f   : > { %v777_v30 = vpop.xlane.xlu1 %776 }
 0x2a0   : > { %3356 = vpow2.f32 %v787_v29  ;;  %v783_v31 = vsub.f32 %v722_v9, %v777_v30  ;;  %v3169_v9 = vld [vmem:[#allocation7 + $0xa8] ss:$16 sps:$4 sm:$0xff]   ;;  %v3196_v29 = vld [vmem:[#allocation7] ss:$16 sps:$4 sm:$0xff]   ;;  %v3198_v30 = vld [vmem:[#allocation7 + $0x4] ss:$16 sps:$4 sm:$0xff]  }
 0x2a2   : > { %v789_v32 = vmul.f32 1.442695, %v783_v31  ;;  %v3199_v31 = vld [vmem:[#allocation7 + $0x8] ss:$16 sps:$4 sm:$0xff]  }
 0x2a3   : > { %v780_v33 = vpop.xlane.xlu1 %779 }
 0x2a4   : > { %3358 = vpow2.f32 %v789_v32  ;;  %v784_v34 = vsub.f32 %v762_v14, %v780_v33  ;;  %v3175_v14 = vld [vmem:[#allocation7 + $0x88] ss:$16 sps:$4 sm:$0xff]   ;;  %v3201_v32 = vld [vmem:[#allocation7 + $0xc] ss:$16 sps:$4 sm:$0xff]  }
 0x2a5   : > { %v3204_v33 = vld [vmem:[#allocation8 + $0xac] ss:$12 sps:$4 sm:$0xff]  }
 0x2a6   : > { %v791_v35 = vmul.f32 1.442695, %v784_v34  ;;  %v3207_v34 = vld [vmem:[#allocation8 + $0x22c] ss:$12 sps:$4 sm:$0xff]  }
 0x2a8   : > { %3360 = vpow2.f32 %v791_v35 }
 0x2a9   : > { %v3355_v36 = vpop.eup %3354 }
 0x2aa   : > { %v793_v37 = vsel %vm768_vm3, %v3355_v36, 0.0 }
 0x2ab   : > { %794 = vadd.xlane.f32.xlu0 %v793_v37 }
 0x2ad   : > { %v3357_v38 = vpop.eup %3356 }
 0x2ae   : > { %v796_v39 = vsel %vm768_vm3, %v3357_v38, 0.0 }
 0x2af   : > { %797 = vadd.xlane.f32.xlu1 %v796_v39 }
 0x2b1   : > { %v3359_v40 = vpop.eup %3358 }
 0x2b2   : > { %v799_v41 = vsel %vm768_vm3, %v3359_v40, 0.0 }
 0x2b3   : > { %800 = vadd.xlane.f32.xlu0 %v799_v41  ;;  %v3205_v41 = vld [vmem:[#allocation8 + $0x228] ss:$12 sps:$4 sm:$0xff]  }
 0x2b5   : > { %v3361_v42 = vpop.eup %3360 }
 0x2b6   : > { %v802_v43 = vsel %vm768_vm3, %v3361_v42, 0.0 }
 0x2b7   : > { %803 = vadd.xlane.f32.xlu1 %v802_v43 }
 0x334   : > { %v795_v44 = vpop.xlane.xlu0 %794 }
 0x335   : > { %3362 = vrcp.f32 %v795_v44  ;;  %v3210_v44 = vld [vmem:[#allocation8 + $0x94] ss:$12 sps:$4 sm:$0xff]  }
 0x338   : > { %v798_v46 = vpop.xlane.xlu1 %797 }
 0x339   : > { %3364 = vrcp.f32 %v798_v46  ;;  %v3213_v46 = vld [vmem:[#allocation8 + $0x214] ss:$12 sps:$4 sm:$0xff]  }
 0x33c   : > { %v801_v47 = vpop.xlane.xlu0 %800 }
 0x33d   : > { %3366 = vrcp.f32 %v801_v47 }
 0x340   : > { %v804_v48 = vpop.xlane.xlu1 %803 }
 0x341   : > { %3368 = vrcp.f32 %v804_v48 }
 0x342   : > { %v3363_v49 = vpop.eup %3362 }
 0x343   : > { %v806_v50 = vmul.f32 %v3363_v49, %v3355_v36  ;;  %v3208_v49 = vld [vmem:[#allocation8 + $0x90] ss:$12 sps:$4 sm:$0xff]  }
 0x345   : > { %v813_v51 = vpack.c.bf16 %v806_v50, %v806_v50  ;;  %v3211_v50 = vld [vmem:[#allocation8 + $0x210] ss:$12 sps:$4 sm:$0xff]  }
 0x346   : > { %v3365_v54 = vpop.eup %3364 }
 0x347   : > { %3005 = vmatmul.mubr.msk.bf16.vlgmr.msra.gmra.mxu1 %vm768_vm3, %v813_v51  ;;  %v808_v55 = vmul.f32 %v3365_v54, %v3357_v38  ;;  %v3216_v54 = vld [vmem:[#allocation8 + $0x7c] ss:$12 sps:$4 sm:$0xff]  }
 0x348   : > { %3015 = vmatpush3.bf16.msra.mxu1 %v3851_v53  ;;  %3016 = vmatprep.mubr.msk.bf16.mxu1 %vm3599_vm1, %v3598_v13 }
 0x349   : > { %v814_v56 = vpack.c.bf16 %v808_v55, %v808_v55  ;;  %1218 = vmatprep.subr.bf16.mxu1 %v3156_v52  ;;  %v3219_v55 = vld [vmem:[#allocation8 + $0x1fc] ss:$12 sps:$4 sm:$0xff]  }
 0x34a   : > { %v3367_v58 = vpop.eup %3366 }
 0x34b   : > { %3011 = vmatmul.mubr.msk.bf16.vlgmr.msra.gmra.mxu0 %vm768_vm3, %v814_v56  ;;  %v810_v59 = vmul.f32 %v3367_v58, %v3359_v40  ;;  %v3202_v40 = vld [vmem:[#allocation8 + $0xa8] ss:$12 sps:$4 sm:$0xff]  }
 0x34c   : > { %3021 = vmatpush3.bf16.msra.mxu0 %v3855_v60  ;;  %3022 = vmatprep.mubr.msk.bf16.mxu0 %vm3599_vm1, %v3598_v13  ;;  %v3168_v60 = vld [vmem:[#allocation7 + $0xa4] ss:$16 sps:$4 sm:$0xff]   ;;  %v3163_v13 = vld [vmem:[#allocation7 + $0xc8] ss:$16 sps:$4 sm:$0xff]  }
 0x34d   : > { %v815_v62 = vpack.c.bf16 %v810_v59, %v810_v59  ;;  %1271 = vmatprep.subr.bf16.mxu0 %v3159_v57  ;;  %v3214_v59 = vld [vmem:[#allocation8 + $0x78] ss:$12 sps:$4 sm:$0xff]  }
 0x34e   : > { %v3369_v53 = vpop.eup %3368 }
 0x34f   : > { %3017 = vmatmul.mubr.msk.bf16.vlgmr.msra.gmra.mxu1 %vm768_vm3, %v815_v62  ;;  %v812_v1 = vmul.f32 %v3369_v53, %v3361_v42  ;;  %v3225_v53 = vld [vmem:[#allocation8 + $0x1e4] ss:$12 sps:$4 sm:$0xff]  }
 0x350   : > { %1219 = vmatpush1.bf16.msra.mxu1 %v3154_v61  ;;  %1250 = vmatprep.mubr.bf16.mxu1 %v3597_v0  ;;  %v3217_v61 = vld [vmem:[#allocation8 + $0x1f8] ss:$12 sps:$4 sm:$0xff]  }
 0x351   : > { %v816_v4 = vpack.c.bf16 %v812_v1, %v812_v1  ;;  %1220 = vmatprep.subr.bf16.mxu1 %v3162_v63 }
 0x353   : > { %3023 = vmatmul.mubr.msk.bf16.vlgmr.msra.gmra.mxu0 %vm768_vm3, %v816_v4 }
 0x354   : > { %1272 = vmatpush1.bf16.msra.mxu0 %v3157_v2  ;;  %1221 = vmatpush1.bf16.msra.mxu1 %v3160_v3  ;;  %v3220_v2 = vld [vmem:[#allocation8 + $0x60] ss:$12 sps:$4 sm:$0xff]  }
 0x355   : > { %1273 = vmatprep.subr.bf16.mxu0 %v3165_v5  ;;  %1222 = vmatprep.subr.bf16.mxu1 %v3168_v60  ;;  %v3223_v3 = vld [vmem:[#allocation8 + $0x1e0] ss:$12 sps:$4 sm:$0xff]  }
 0x356   : > { %1303 = vmatprep.mubr.bf16.mxu0 %v3597_v0  ;;  %v3228_v5 = vld [vmem:[#allocation8 + $0x4c] ss:$12 sps:$4 sm:$0xff]  }
 0x357   : > { %v3231_v60 = vld [vmem:[#allocation8 + $0x1cc] ss:$12 sps:$4 sm:$0xff]  }
 0x358   : > { %1274 = vmatpush1.bf16.msra.mxu0 %v3163_v13  ;;  %1223 = vmatpush1.bf16.msra.mxu1 %v3166_v6  ;;  %v3226_v13 = vld [vmem:[#allocation8 + $0x48] ss:$12 sps:$4 sm:$0xff]  }
 0x359   : > { %1275 = vmatprep.subr.bf16.mxu0 %v3171_v7  ;;  %1224 = vmatprep.subr.bf16.mxu1 %v3174_v8  ;;  %v3229_v6 = vld [vmem:[#allocation8 + $0x1c8] ss:$12 sps:$4 sm:$0xff]  }
 0x35a   : > { %v3234_v7 = vld [vmem:[#allocation8 + $0x34] ss:$12 sps:$4 sm:$0xff]  }
 0x35b   : > { %v3237_v8 = vld [vmem:[#allocation8 + $0x1b4] ss:$12 sps:$4 sm:$0xff]  }
 0x35c   : > { %1276 = vmatpush1.bf16.msra.mxu0 %v3169_v9  ;;  %1225 = vmatpush1.bf16.msra.mxu1 %v3172_v10  ;;  %v3232_v9 = vld [vmem:[#allocation8 + $0x30] ss:$12 sps:$4 sm:$0xff]  }
 0x35d   : > { %1277 = vmatprep.subr.bf16.mxu0 %v3177_v11  ;;  %1226 = vmatprep.subr.bf16.mxu1 %v3180_v12  ;;  %v3235_v10 = vld [vmem:[#allocation8 + $0x1b0] ss:$12 sps:$4 sm:$0xff]  }
 0x35e   : > { %v3240_v11 = vld [vmem:[#allocation8 + $0x1c] ss:$12 sps:$4 sm:$0xff]  }
 0x35f   : > { %v3243_v12 = vld [vmem:[#allocation8 + $0x19c] ss:$12 sps:$4 sm:$0xff]  }
 0x360   : > { %1278 = vmatpush1.bf16.msra.mxu0 %v3175_v14  ;;  %1227 = vmatpush1.bf16.msra.mxu1 %v3178_v17  ;;  %v3238_v14 = vld [vmem:[#allocation8 + $0x18] ss:$12 sps:$4 sm:$0xff]  }
 0x361   : > { %1279 = vmatprep.subr.bf16.mxu0 %v3183_v18  ;;  %1228 = vmatprep.subr.bf16.mxu1 %v3186_v20  ;;  %v3241_v17 = vld [vmem:[#allocation8 + $0x198] ss:$12 sps:$4 sm:$0xff]  }
 0x362   : > { %v3246_v18 = vld [vmem:[#allocation8 + $0x4] ss:$12 sps:$4 sm:$0xff]  }
 0x363   : > { %v3249_v20 = vld [vmem:[#allocation8 + $0x184] ss:$12 sps:$4 sm:$0xff]  }
 0x364   : > { %1280 = vmatpush1.bf16.msra.mxu0 %v3181_v21  ;;  %1229 = vmatpush1.bf16.msra.mxu1 %v3184_v22  ;;  %v3244_v21 = vld [vmem:[#allocation8] ss:$12 sps:$4 sm:$0xff]  }
 0x365   : > { %1281 = vmatprep.subr.bf16.mxu0 %v3189_v23  ;;  %1230 = vmatprep.subr.bf16.mxu1 %v3192_v24  ;;  %v3247_v22 = vld [vmem:[#allocation8 + $0x180] ss:$12 sps:$4 sm:$0xff]  }
 0x366   : > { %v3252_v23 = vld [vmem:[#allocation8 + $0x16c] ss:$12 sps:$4 sm:$0xff]  }
 0x367   : > { %v3255_v24 = vld [vmem:[#allocation8 + $0x2ec] ss:$12 sps:$4 sm:$0xff]  }
 0x368   : > { %1282 = vmatpush1.bf16.msra.mxu0 %v3187_v25  ;;  %1231 = vmatpush1.bf16.msra.mxu1 %v3190_v26  ;;  %v3250_v25 = vld [vmem:[#allocation8 + $0x168] ss:$12 sps:$4 sm:$0xff]  }
 0x369   : > { %1283 = vmatprep.subr.bf16.mxu0 %v3195_v27  ;;  %1232 = vmatprep.subr.bf16.mxu1 %v3198_v30  ;;  %v3253_v26 = vld [vmem:[#allocation8 + $0x2e8] ss:$12 sps:$4 sm:$0xff]   ;;  %v3259_v30 = vld [vmem:[#allocation8 + $0x2d0] ss:$12 sps:$4 sm:$0xff]  }
 0x36a   : > { %v3258_v27 = vld [vmem:[#allocation8 + $0x154] ss:$12 sps:$4 sm:$0xff]  }
 0x36c   : > { %1284 = vmatpush1.bf16.msra.mxu0 %v3193_v28  ;;  %1233 = vmatpush1.bf16.msra.mxu1 %v3196_v29  ;;  %v3261_v28 = vld [vmem:[#allocation8 + $0x2d4] ss:$12 sps:$4 sm:$0xff]   ;;  %v3256_v29 = vld [vmem:[#allocation8 + $0x150] ss:$12 sps:$4 sm:$0xff]  }
 0x36d   : > { %1285 = vmatprep.subr.bf16.mxu0 %v3201_v32  ;;  %2005 = vmatprep.subr.bf16.mxu1 %v3204_v33  ;;  %v3267_v32 = vld [vmem:[#allocation8 + $0x2bc] ss:$12 sps:$4 sm:$0xff]   ;;  %v3262_v33 = vld [vmem:[#allocation8 + $0x138] ss:$12 sps:$4 sm:$0xff]  }
 0x370   : > { %1286 = vmatpush1.bf16.msra.mxu0 %v3199_v31  ;;  %v3264_v31 = vld [vmem:[#allocation8 + $0x13c] ss:$12 sps:$4 sm:$0xff]  }
 0x371   : > { %2058 = vmatprep.subr.bf16.mxu0 %v3207_v34  ;;  %v3265_v34 = vld [vmem:[#allocation8 + $0x2b8] ss:$12 sps:$4 sm:$0xff]  }
 0x407   : > { %v858_v35 = vpop.f32.mrf.mxu1 }
 0x409   : > { %v3006_v36 = vpop.f32.mrf.mxu1 }
 0x40a   : > { %v3273_v36 = vld [vmem:[#allocation8 + $0x2a4] ss:$12 sps:$4 sm:$0xff]  }
 0x40b   : > { %v861_v37 = vpop.f32.mrf.mxu1  ;;  %v904_v38 = vpop.f32.mrf.mxu0 }
 0x40c   : > { %v1002_v39 = vpack.c.bf16 %v904_v38, %v858_v35  ;;  %v3270_v35 = vld [vmem:[#allocation8 + $0x124] ss:$12 sps:$4 sm:$0xff]   ;;  %v3268_v37 = vld [vmem:[#allocation8 + $0x120] ss:$12 sps:$4 sm:$0xff]  }
 0x40d   : > { %v3007_v42 = vpop.f32.mrf.mxu1  ;;  %v3012_v43 = vpop.f32.mrf.mxu0  ;;  %v3271_v38 = vld [vmem:[#allocation8 + $0x2a0] ss:$12 sps:$4 sm:$0xff]  }
 0x40e   : > { %1251 = vmatmul.mubr.bf16.vlgmr.msra.gmra.mxu1 %v1002_v39  ;;  %1304 = vmatmul.mubr.bf16.vlgmr.msra.gmra.mxu0 %v1002_v39  ;;  %v3276_v39 = vld [vmem:[#allocation8 + $0x10c] ss:$12 sps:$4 sm:$0xff]   ;;  %v3277_v42 = vld [vmem:[#allocation8 + $0x288] ss:$12 sps:$4 sm:$0xff]  }
 0x40f   : > { %v907_v47 = vpop.f32.mrf.mxu0  ;;  %v950_v48 = vpop.f32.mrf.mxu1  ;;  %1260 = vmatprep.mubr.bf16.mxu1 %v3597_v0  ;;  %1313 = vmatprep.mubr.bf16.mxu0 %v3597_v0  ;;  %v3222_v0 = vld [vmem:[#allocation8 + $0x64] ss:$12 sps:$4 sm:$0xff]   ;;  %v3282_v43 = vld [vmem:[#allocation8 + $0xf4] ss:$12 sps:$4 sm:$0xff]  }
 0x410   : > { %2006 = vmatpush1.bf16.msra.mxu1 %v3202_v40  ;;  %2059 = vmatpush1.bf16.msra.mxu0 %v3205_v41  ;;  %v3279_v40 = vld [vmem:[#allocation8 + $0x28c] ss:$12 sps:$4 sm:$0xff]   ;;  %v3274_v41 = vld [vmem:[#allocation8 + $0x108] ss:$12 sps:$4 sm:$0xff]   ;;  %v3283_v47 = vld [vmem:[#allocation8 + $0x270] ss:$12 sps:$4 sm:$0xff]  }
 0x411   : > { %v3013_v51 = vpop.f32.mrf.mxu0  ;;  %v3018_v52 = vpop.f32.mrf.mxu1  ;;  %2007 = vmatprep.subr.bf16.mxu1 %v3210_v44  ;;  %2060 = vmatprep.subr.bf16.mxu0 %v3213_v46  ;;  %v3285_v44 = vld [vmem:[#allocation8 + $0x274] ss:$12 sps:$4 sm:$0xff]   ;;  %v3280_v46 = vld [vmem:[#allocation8 + $0xf0] ss:$12 sps:$4 sm:$0xff]  }
 0x412   : > { %v3289_v51 = vld [vmem:[#allocation8 + $0x258] ss:$12 sps:$4 sm:$0xff]  }
 0x413   : > { %v953_v56 = vpop.f32.mrf.mxu1  ;;  %v996_v57 = vpop.f32.mrf.mxu0  ;;  %v3294_v52 = vld [vmem:[#allocation8 + $0xc4] ss:$12 sps:$4 sm:$0xff]  }
 0x414   : > { %v1003_v58 = vpack.c.bf16 %v996_v57, %v950_v48  ;;  %2008 = vmatpush1.bf16.msra.mxu1 %v3208_v49  ;;  %2061 = vmatpush1.bf16.msra.mxu0 %v3211_v50  ;;  %v3288_v48 = vld [vmem:[#allocation8 + $0xdc] ss:$12 sps:$4 sm:$0xff]   ;;  %v3286_v50 = vld [vmem:[#allocation8 + $0xd8] ss:$12 sps:$4 sm:$0xff]   ;;  %v3295_v56 = vld [vmem:[#allocation8 + $0x240] ss:$12 sps:$4 sm:$0xff]  }
 0x415   : > { %v3019_v62 = vpop.f32.mrf.mxu1  ;;  %v3024_v63 = vpop.f32.mrf.mxu0  ;;  %2009 = vmatprep.subr.bf16.mxu1 %v3216_v54  ;;  %2062 = vmatprep.subr.bf16.mxu0 %v3219_v55  ;;  %v3291_v49 = vld [vmem:[#allocation8 + $0x25c] ss:$12 sps:$4 sm:$0xff]   ;;  %v3297_v54 = vld [vmem:[#allocation8 + $0x244] ss:$12 sps:$4 sm:$0xff]   ;;  %v3292_v55 = vld [vmem:[#allocation8 + $0xc0] ss:$12 sps:$4 sm:$0xff]  }
 0x416   : > { %1261 = vmatmul.mubr.bf16.gmra.mxu1 %v1003_v58  ;;  %1314 = vmatmul.mubr.bf16.gmra.mxu0 %v1003_v58  ;;  %v3298_v57 = vld [vmem:[#allocation8 + $0x170] ss:$12 sps:$4 sm:$0xff]  }
 0x417   : > { %v999_v1 = vpop.f32.mrf.mxu0  ;;  %v3299_v58 = vld [vmem:[#allocation8 + $0x2f0] ss:$12 sps:$4 sm:$0xff]  }
 0x418   : > { %2010 = vmatpush1.bf16.msra.mxu1 %v3214_v59  ;;  %2063 = vmatpush1.bf16.msra.mxu0 %v3217_v61  ;;  %v1052_v59 = vsub.s32 3, %v3821_v15  ;;  %v1036_v61 = vld [vmem:[%s3976_s4] sm:$0xf] }
 0x419   : > { %v3025_v4 = vpop.f32.mrf.mxu0  ;;  %2011 = vmatprep.subr.bf16.mxu1 %v3222_v0  ;;  %2064 = vmatprep.subr.bf16.mxu0 %v3225_v53  ;;  %v1045_v0 = vrot.slane %v1036_v61, %v3824_v16  ;;  %v1041_v1 = vrot.slane %v1036_v61, %v3831_v19 }
 0x41a   : > { %v1053_v53 = vrot.slane %v1036_v61, %v1052_v59 }
 0x41c   : > { %2012 = vmatpush1.bf16.msra.mxu1 %v3220_v2  ;;  %2065 = vmatpush1.bf16.msra.mxu0 %v3223_v3  ;;  %v1049_v2 = vrot.slane %v1036_v61, %v3847_v45 }
 0x41d   : > { %2013 = vmatprep.subr.bf16.mxu1 %v3228_v5  ;;  %2066 = vmatprep.subr.bf16.mxu0 %v3231_v60 }
 0x420   : > { %2014 = vmatpush1.bf16.msra.mxu1 %v3226_v13  ;;  %2067 = vmatpush1.bf16.msra.mxu0 %v3229_v6 }
 0x421   : > { %2015 = vmatprep.subr.bf16.mxu1 %v3234_v7  ;;  %2068 = vmatprep.subr.bf16.mxu0 %v3237_v8 }
 0x424   : > { %2016 = vmatpush1.bf16.msra.mxu1 %v3232_v9  ;;  %2069 = vmatpush1.bf16.msra.mxu0 %v3235_v10 }
 0x425   : > { %2017 = vmatprep.subr.bf16.mxu1 %v3240_v11  ;;  %2070 = vmatprep.subr.bf16.mxu0 %v3243_v12 }
 0x428   : > { %2018 = vmatpush1.bf16.msra.mxu1 %v3238_v14  ;;  %2071 = vmatpush1.bf16.msra.mxu0 %v3241_v17 }
 0x429   : > { %2019 = vmatprep.subr.bf16.mxu1 %v3246_v18  ;;  %2072 = vmatprep.subr.bf16.mxu0 %v3249_v20 }
 0x42c   : > { %2020 = vmatpush1.bf16.msra.mxu1 %v3244_v21  ;;  %2073 = vmatpush1.bf16.msra.mxu0 %v3247_v22 }
 0x42d   : > { %2021 = vmatprep.subr.bf16.mxu1 %v3252_v23  ;;  %2074 = vmatprep.subr.bf16.mxu0 %v3255_v24 }
 0x430   : > { %2022 = vmatpush2.bf16.msra.mxu1 %v3250_v25  ;;  %2075 = vmatpush2.bf16.msra.mxu0 %v3253_v26 }
 0x431   : > { %2023 = vmatprep.subr.bf16.mxu1 %v3258_v27  ;;  %2076 = vmatprep.subr.bf16.mxu0 %v3261_v28 }
 0x434   : > { %2024 = vmatpush2.bf16.msra.mxu1 %v3256_v29  ;;  %2077 = vmatpush2.bf16.msra.mxu0 %v3259_v30 }
 0x435   : > { %2025 = vmatprep.subr.bf16.mxu1 %v3264_v31  ;;  %2078 = vmatprep.subr.bf16.mxu0 %v3267_v32  ;;  %v3300_v32 = vld [vmem:[#allocation8 + $0xb0] ss:$12 sps:$4 sm:$0xff]  }
 0x438   : > { %2026 = vmatpush2.bf16.msra.mxu1 %v3262_v33  ;;  %2079 = vmatpush2.bf16.msra.mxu0 %v3265_v34  ;;  %v3301_v33 = vld [vmem:[#allocation8 + $0x230] ss:$12 sps:$4 sm:$0xff]  }
 0x439   : > { %2027 = vmatprep.subr.bf16.mxu1 %v3270_v35  ;;  %2080 = vmatprep.subr.bf16.mxu0 %v3273_v36 }
 0x43c   : > { %2028 = vmatpush2.bf16.msra.mxu1 %v3268_v37  ;;  %2081 = vmatpush2.bf16.msra.mxu0 %v3271_v38 }
 0x43d   : > { %2029 = vmatprep.subr.bf16.mxu1 %v3276_v39  ;;  %2082 = vmatprep.subr.bf16.mxu0 %v3279_v40  ;;  %v3302_v39 = vld [vmem:[#allocation8 + $0x158] ss:$12 sps:$4 sm:$0xff]  }
 0x43e   : > { %v3303_v40 = vld [vmem:[#allocation8 + $0x2d8] ss:$12 sps:$4 sm:$0xff]  }
 0x440   : > { %2030 = vmatpush2.bf16.msra.mxu1 %v3274_v41  ;;  %2083 = vmatpush2.bf16.msra.mxu0 %v3277_v42 }
 0x441   : > { %2031 = vmatprep.subr.bf16.mxu1 %v3282_v43  ;;  %2084 = vmatprep.subr.bf16.mxu0 %v3285_v44 }
 0x444   : > { %2032 = vmatpush2.bf16.msra.mxu1 %v3280_v46  ;;  %2085 = vmatpush2.bf16.msra.mxu0 %v3283_v47 }
 0x445   : > { %2033 = vmatprep.subr.bf16.mxu1 %v3288_v48  ;;  %2086 = vmatprep.subr.bf16.mxu0 %v3291_v49 }
 0x448   : > { %2034 = vmatpush2.bf16.msra.mxu1 %v3286_v50  ;;  %2087 = vmatpush2.bf16.msra.mxu0 %v3289_v51  ;;  %v3304_v51 = vld [vmem:[#allocation8 + $0x98] ss:$12 sps:$4 sm:$0xff]  }
 0x449   : > { %2035 = vmatprep.subr.bf16.mxu1 %v3294_v52  ;;  %2088 = vmatprep.subr.bf16.mxu0 %v3297_v54  ;;  %v3305_v52 = vld [vmem:[#allocation8 + $0x218] ss:$12 sps:$4 sm:$0xff]  }
 0x44c   : > { %2036 = vmatpush2.bf16.msra.mxu1 %v3292_v55  ;;  %2089 = vmatpush2.bf16.msra.mxu0 %v3295_v56  ;;  %v3306_v56 = vld [vmem:[#allocation8 + $0x140] ss:$12 sps:$4 sm:$0xff]  }
 0x44d   : > { %2876 = vmatprep.subr.bf16.mxu1 %v3298_v57  ;;  %2904 = vmatprep.subr.bf16.mxu0 %v3299_v58  ;;  %v3307_v57 = vld [vmem:[#allocation8 + $0x2c0] ss:$12 sps:$4 sm:$0xff]  }
 0x4ce   : > { %v1252_v62 = vpop.f32.mrf.mxu1  ;;  %v1305_v63 = vpop.f32.mrf.mxu0 }
 0x4cf   : > { %v1253_v8 = vadd.f32 %v1252_v62, %v1041_v1  ;;  %v1306_v9 = vadd.f32 %v1305_v63, %v1049_v2 }
 0x4d0   : > { %v1254_v3 = vpop.f32.mrf.mxu1  ;;  %v1307_v4 = vpop.f32.mrf.mxu0 }
 0x4d1   : > { %v1255_v13 = vadd.f32 %v1254_v3, %v1045_v0  ;;  %v1308_v6 = vadd.f32 %v1307_v4, %v1053_v53  ;;  %v1324_v26 = vmax.f32 %v1253_v8, 0.0  ;;  %v1326_v27 = vmax.f32 %v1306_v9, 0.0  ;;  %v3309_v3 = vld [vmem:[#allocation8 + $0x200] ss:$12 sps:$4 sm:$0xff]   ;;  %v3315_v8 = vld [vmem:[#allocation8 + $0x290] ss:$12 sps:$4 sm:$0xff]  }
 0x4d2   : > { %v1256_v5 = vpop.f32.mrf.mxu1  ;;  %v1309_v60 = vpop.f32.mrf.mxu0  ;;  %v3316_v9 = vld [vmem:[#allocation8 + $0x50] ss:$12 sps:$4 sm:$0xff]  }
 0x4d3   : > { %v1257_v15 = vadd.f32 %v1256_v5, %v1041_v1  ;;  %v1310_v7 = vadd.f32 %v1309_v60, %v1049_v2  ;;  %v1325_v22 = vmax.f32 %v1255_v13, 0.0  ;;  %v1327_v23 = vmax.f32 %v1308_v6, 0.0  ;;  %v3310_v60 = vld [vmem:[#allocation8 + $0x128] ss:$12 sps:$4 sm:$0xff]  }
 0x4d4   : > { %v1258_v10 = vpop.f32.mrf.mxu1  ;;  %v1311_v11 = vpop.f32.mrf.mxu0  ;;  %v3311_v13 = vld [vmem:[#allocation8 + $0x2a8] ss:$12 sps:$4 sm:$0xff]  }
 0x4d5   : > { %v1259_v12 = vadd.f32 %v1258_v10, %v1045_v0  ;;  %v1312_v14 = vadd.f32 %v1311_v11, %v1053_v53  ;;  %v1328_v17 = vmax.f32 %v1257_v15, 0.0  ;;  %v1330_v18 = vmax.f32 %v1310_v7, 0.0  ;;  %v3312_v6 = vld [vmem:[#allocation8 + $0x68] ss:$12 sps:$4 sm:$0xff]   ;;  %v3314_v7 = vld [vmem:[#allocation8 + $0x110] ss:$12 sps:$4 sm:$0xff]  }
 0x4d6   : > { %v1262_v20 = vpop.f32.mrf.mxu1  ;;  %v1315_v21 = vpop.f32.mrf.mxu0  ;;  %v3313_v15 = vld [vmem:[#allocation8 + $0x1e8] ss:$12 sps:$4 sm:$0xff]   ;;  %v3317_v10 = vld [vmem:[#allocation8 + $0x1d0] ss:$12 sps:$4 sm:$0xff]   ;;  %v3318_v11 = vld [vmem:[#allocation8 + $0xf8] ss:$12 sps:$4 sm:$0xff]  }
 0x4d7   : > { %v1329_v24 = vmax.f32 %v1259_v12, 0.0  ;;  %v1331_v25 = vmax.f32 %v1312_v14, 0.0  ;;  %v3889_v34 = vpack.c.bf16 %v1328_v17, %v1324_v26  ;;  %v3891_v35 = vpack.c.bf16 %v1330_v18, %v1326_v27  ;;  %v3319_v12 = vld [vmem:[#allocation8 + $0x278] ss:$12 sps:$4 sm:$0xff]   ;;  %v3322_v18 = vld [vmem:[#allocation8 + $0xe0] ss:$12 sps:$4 sm:$0xff]  }
 0x4d8   : > { %v1264_v28 = vpop.f32.mrf.mxu1  ;;  %v1317_v29 = vpop.f32.mrf.mxu0  ;;  %v1263_v44 = vadd.f32 %v1262_v20, %v1041_v1  ;;  %v1316_v46 = vadd.f32 %v1315_v21, %v1049_v2  ;;  %v3320_v14 = vld [vmem:[#allocation8 + $0x38] ss:$12 sps:$4 sm:$0xff]   ;;  %v3323_v20 = vld [vmem:[#allocation8 + $0x260] ss:$12 sps:$4 sm:$0xff]   ;;  %v3329_v26 = vld [vmem:[#allocation8 + $0x188] ss:$12 sps:$4 sm:$0xff]  }
 0x4d9   : > { %v1341_v30 = vpack.c.bf16 %v1329_v24, %v1325_v22  ;;  %v1343_v31 = vpack.c.bf16 %v1331_v25, %v1327_v23  ;;  %v1265_v36 = vadd.f32 %v1264_v28, %v1045_v0  ;;  %v1318_v41 = vadd.f32 %v1317_v29, %v1053_v53  ;;  %v3321_v17 = vld [vmem:[#allocation8 + $0x1b8] ss:$12 sps:$4 sm:$0xff]   ;;  %v3324_v21 = vld [vmem:[#allocation8 + $0x20] ss:$12 sps:$4 sm:$0xff]   ;;  %v3326_v23 = vld [vmem:[#allocation8 + $0xc8] ss:$12 sps:$4 sm:$0xff]  }
 0x4da   : > { %v1266_v37 = vpop.f32.mrf.mxu1  ;;  %v1319_v38 = vpop.f32.mrf.mxu0  ;;  %v1332_v63 = vmax.f32 %v1263_v44, 0.0  ;;  %v3325_v22 = vld [vmem:[#allocation8 + $0x1a0] ss:$12 sps:$4 sm:$0xff]   ;;  %v3327_v24 = vld [vmem:[#allocation8 + $0x248] ss:$12 sps:$4 sm:$0xff]   ;;  %v3330_v27 = vld [vmem:[#allocation10 + $0x78] sm:$0xff]  }
 0x4db   : > { %v1267_v42 = vadd.f32 %v1266_v37, %v1041_v1  ;;  %v1320_v43 = vadd.f32 %v1319_v38, %v1049_v2  ;;  %2037 = vmatprep.mubr.bf16.mxu1 %v1341_v30  ;;  %2090 = vmatprep.mubr.bf16.mxu0 %v1343_v31  ;;  %v1333_v58 = vmax.f32 %v1265_v36, 0.0  ;;  %v1335_v59 = vmax.f32 %v1318_v41, 0.0  ;;  %v3328_v25 = vld [vmem:[#allocation8 + $0x8] ss:$12 sps:$4 sm:$0xff]   ;;  %v3331_v28 = vld [vmem:[#allocation10 + $0x38] sm:$0xff]   ;;  %v3344_v41 = vld [vmem:[#allocation10 + $0x40] sm:$0xff]  }
 0x4dc   : > { %v1268_v47 = vpop.f32.mrf.mxu1  ;;  %v1321_v48 = vpop.f32.mrf.mxu0  ;;  %2038 = vmatmul.mubr.bf16.vlgmr.msra.gmra.mxu1 %v3889_v34  ;;  %2091 = vmatmul.mubr.bf16.vlgmr.msra.gmra.mxu0 %v3891_v35  ;;  %v1334_v1 = vmax.f32 %v1316_v46, 0.0  ;;  %v3332_v29 = vld [vmem:[#allocation10 + $0x70] sm:$0xff]   ;;  %v3339_v36 = vld [vmem:[#allocation10 + $0x18] sm:$0xff]   ;;  %v3348_v46 = vld [vmem:[#allocation10 + $0xa8] sm:$0xff]  }
 0x4dd   : > { %v1269_v49 = vadd.f32 %v1268_v47, %v1045_v0  ;;  %v1322_v50 = vadd.f32 %v1321_v48, %v1053_v53  ;;  %2877 = vmatpush3.bf16.msra.mxu1 %v3300_v32  ;;  %2905 = vmatpush3.bf16.msra.mxu0 %v3301_v33  ;;  %v1336_v54 = vmax.f32 %v1267_v42, 0.0  ;;  %v1338_v55 = vmax.f32 %v1320_v43, 0.0  ;;  %v3308_v53 = vld [vmem:[#allocation8 + $0x80] ss:$12 sps:$4 sm:$0xff]   ;;  %v3340_v37 = vld [vmem:[#allocation10 + $0x50] sm:$0xff]   ;;  %v3346_v43 = vld [vmem:[#allocation10 + $0xb8] sm:$0xff]  }
 0x4de   : > { %2878 = vmatprep.subr.bf16.mxu1 %v3302_v39  ;;  %2906 = vmatprep.subr.bf16.mxu0 %v3303_v40  ;;  %v3335_v32 = vld [vmem:[#allocation10 + $0x28] sm:$0xff]   ;;  %v3336_v33 = vld [vmem:[#allocation10 + $0x60] sm:$0xff]   ;;  %v3341_v38 = vld [vmem:[#allocation10 + $0x10] sm:$0xff]  }
 0x4df   : > { %v1337_v61 = vmax.f32 %v1269_v49, 0.0  ;;  %v1339_v62 = vmax.f32 %v1322_v50, 0.0  ;;  %v3899_v4 = vpack.c.bf16 %v1336_v54, %v1332_v63  ;;  %v3901_v5 = vpack.c.bf16 %v1338_v55, %v1334_v1  ;;  %v3342_v39 = vld [vmem:[#allocation10 + $0x48] sm:$0xff]   ;;  %v3345_v42 = vld [vmem:[#allocation10] sm:$0xff]   ;;  %v3347_v44 = vld [vmem:[#allocation10 + $0xb0] sm:$0xff]  }
 0x4e0   : > { %v3343_v40 = vld [vmem:[#allocation10 + $0x8] sm:$0xff]   ;;  %v3349_v47 = vld [vmem:[#allocation10 + $0xa0] sm:$0xff]   ;;  %v3350_v48 = vld [vmem:[#allocation10 + $0x98] sm:$0xff]  }
 0x4e1   : > { %v3895_v2 = vpack.c.bf16 %v1337_v61, %v1333_v58  ;;  %v3897_v0 = vpack.c.bf16 %v1339_v62, %v1335_v59  ;;  %2879 = vmatpush3.bf16.msra.mxu1 %v3304_v51  ;;  %2907 = vmatpush3.bf16.msra.mxu0 %v3305_v52  ;;  %v3351_v49 = vld [vmem:[#allocation10 + $0x90] sm:$0xff]   ;;  %v3352_v50 = vld [vmem:[#allocation10 + $0x88] sm:$0xff]   ;;  %v3353_v51 = vld [vmem:[#allocation10 + $0x80] sm:$0xff]  }
 0x4e2   : > { %2880 = vmatprep.subr.bf16.mxu1 %v3306_v56  ;;  %2908 = vmatprep.subr.bf16.mxu0 %v3307_v57  ;;  %v1476_v52 = vld [vmem:[%s3978_s6] sm:$0x7] }
 0x4e3   : > { %2047 = vmatprep.mubr.bf16.mxu1 %v3895_v2  ;;  %2100 = vmatprep.mubr.bf16.mxu0 %v3897_v0  ;;  %v1485_v54 = vrot.slane %v1476_v52, %v3824_v16  ;;  %v1481_v55 = vrot.slane %v1476_v52, %v3831_v19 }
 0x4e4   : > { %2048 = vmatmul.mubr.bf16.gmra.mxu1 %v3899_v4  ;;  %2101 = vmatmul.mubr.bf16.gmra.mxu0 %v3901_v5 }
 0x4e5   : > { %2881 = vmatpush3.bf16.msra.mxu1 %v3308_v53  ;;  %2909 = vmatpush3.bf16.msra.mxu0 %v3309_v3 }
 0x4e6   : > { %2143 = vmatprep.mubr.bf16.mxu1 %v1341_v30  ;;  %2192 = vmatprep.mubr.bf16.mxu0 %v1343_v31  ;;  %v3333_v30 = vld [vmem:[#allocation10 + $0x30] sm:$0xff]   ;;  %v3334_v31 = vld [vmem:[#allocation10 + $0x68] sm:$0xff]  }
 0x4e7   : > { %2882 = vmatprep.subr.bf16.mxu1 %v3310_v60  ;;  %2910 = vmatprep.subr.bf16.mxu0 %v3311_v13 }
 0x4e9   : > { %2883 = vmatpush3.bf16.msra.mxu1 %v3312_v6  ;;  %2911 = vmatpush3.bf16.msra.mxu0 %v3313_v15 }
 0x4ea   : > { %2884 = vmatprep.subr.bf16.mxu1 %v3314_v7  ;;  %2912 = vmatprep.subr.bf16.mxu0 %v3315_v8 }
 0x4ed   : > { %2885 = vmatpush3.bf16.msra.mxu1 %v3316_v9  ;;  %2913 = vmatpush3.bf16.msra.mxu0 %v3317_v10 }
 0x4ee   : > { %2886 = vmatprep.subr.bf16.mxu1 %v3318_v11  ;;  %2914 = vmatprep.subr.bf16.mxu0 %v3319_v12 }
 0x4f1   : > { %2887 = vmatpush3.bf16.msra.mxu1 %v3320_v14  ;;  %2915 = vmatpush3.bf16.msra.mxu0 %v3321_v17 }
 0x4f2   : > { %2888 = vmatprep.subr.bf16.mxu1 %v3322_v18  ;;  %2916 = vmatprep.subr.bf16.mxu0 %v3323_v20 }
 0x4f5   : > { %2889 = vmatpush3.bf16.msra.mxu1 %v3324_v21  ;;  %2917 = vmatpush3.bf16.msra.mxu0 %v3325_v22 }
 0x4f6   : > { %2890 = vmatprep.subr.bf16.mxu1 %v3326_v23  ;;  %2918 = vmatprep.subr.bf16.mxu0 %v3327_v24 }
 0x4f9   : > { %2891 = vmatpush3.bf16.msra.mxu1 %v3328_v25  ;;  %2919 = vmatpush3.bf16.msra.mxu0 %v3329_v26 }
 0x4fa   : > { %2932 = vmatprep.subr.bf16.mxu1 %v3330_v27  ;;  %3026 = vmatprep.subr.bf16.mxu0 %v3346_v43 }
 0x4fc   : > { %2144 = vmatmul.mubr.bf16.vlgmr.msra.gmra.mxu1 %v3889_v34  ;;  %2193 = vmatmul.mubr.bf16.vlgmr.msra.gmra.mxu0 %v3891_v35  ;;  %v3337_v34 = vld [vmem:[#allocation10 + $0x20] sm:$0xff]   ;;  %v3338_v35 = vld [vmem:[#allocation10 + $0x58] sm:$0xff]  }
 0x4fd   : > { %2151 = vmatprep.mubr.bf16.mxu1 %v3895_v2  ;;  %2200 = vmatprep.mubr.bf16.mxu0 %v3897_v0 }
 0x4fe   : > { %2933 = vmatpush3.bf16.msra.mxu1 %v3331_v28  ;;  %3027 = vmatpush3.bf16.msra.mxu0 %v3346_v43 }
 0x4ff   : > { %2934 = vmatprep.subr.bf16.mxu1 %v3332_v29  ;;  %3028 = vmatprep.subr.bf16.mxu0 %v3347_v44 }
 0x502   : > { %2935 = vmatpush3.bf16.msra.mxu1 %v3333_v30  ;;  %3029 = vmatpush3.bf16.msra.mxu0 %v3347_v44 }
 0x503   : > { %2936 = vmatprep.subr.bf16.mxu1 %v3334_v31  ;;  %3030 = vmatprep.subr.bf16.mxu0 %v3348_v46 }
 0x504   : > { %2152 = vmatmul.mubr.bf16.gmra.mxu1 %v3899_v4  ;;  %2201 = vmatmul.mubr.bf16.gmra.mxu0 %v3901_v5 }
 0x506   : > { %2937 = vmatpush3.bf16.msra.mxu1 %v3335_v32  ;;  %3031 = vmatpush3.bf16.msra.mxu0 %v3348_v46 }
 0x507   : > { %2938 = vmatprep.subr.bf16.mxu1 %v3336_v33  ;;  %3032 = vmatprep.subr.bf16.mxu0 %v3349_v47 }
 0x50a   : > { %2939 = vmatpush3.bf16.msra.mxu1 %v3337_v34  ;;  %3033 = vmatpush3.bf16.msra.mxu0 %v3349_v47 }
 0x50b   : > { %2940 = vmatprep.subr.bf16.mxu1 %v3338_v35  ;;  %3034 = vmatprep.subr.bf16.mxu0 %v3350_v48 }
 0x50e   : > { %2941 = vmatpush3.bf16.msra.mxu1 %v3339_v36  ;;  %3035 = vmatpush3.bf16.msra.mxu0 %v3350_v48 }
 0x50f   : > { %2942 = vmatprep.subr.bf16.mxu1 %v3340_v37  ;;  %3036 = vmatprep.subr.bf16.mxu0 %v3351_v49  ;;  %v1489_v37 = vrot.slane %v1476_v52, %v3847_v45 }
 0x512   : > { %2943 = vmatpush3.bf16.msra.mxu1 %v3341_v38  ;;  %3037 = vmatpush3.bf16.msra.mxu0 %v3351_v49 }
 0x513   : > { %2944 = vmatprep.subr.bf16.mxu1 %v3342_v39  ;;  %3038 = vmatprep.subr.bf16.mxu0 %v3352_v50 }
 0x516   : > { %2945 = vmatpush3.bf16.msra.mxu1 %v3343_v40  ;;  %3039 = vmatpush3.bf16.msra.mxu0 %v3352_v50 }
 0x517   : > { %2946 = vmatprep.subr.bf16.mxu1 %v3344_v41  ;;  %3040 = vmatprep.subr.bf16.mxu0 %v3353_v51 }
 0x51a   : > { %2947 = vmatpush3.bf16.msra.mxu1 %v3345_v42  ;;  %3041 = vmatpush3.bf16.msra.mxu0 %v3353_v51 }
 0x59c   : > { %v2039_v56 = vpop.f32.mrf.mxu1  ;;  %v2092_v57 = vpop.f32.mrf.mxu0 }
 0x59d   : > { %v2040_v62 = vadd.f32 %v2039_v56, %v1481_v55 }
 0x59e   : > { %v2041_v58 = vpop.f32.mrf.mxu1  ;;  %v2094_v59 = vpop.f32.mrf.mxu0 }
 0x59f   : > { %v2042_v61 = vadd.f32 %v2041_v58, %v1485_v54  ;;  %v2093_v60 = vadd.f32 %v2092_v57, %v2040_v62 }
 0x5a0   : > { %v2043_v63 = vpop.f32.mrf.mxu1  ;;  %v2096_v1 = vpop.f32.mrf.mxu0 }
 0x5a1   : > { %v2044_v2 = vadd.f32 %v2043_v63, %v1481_v55  ;;  %v2095_v3 = vadd.f32 %v2094_v59, %v2042_v61  ;;  %v2209_v11 = vmax.f32 %v2093_v60, 0.0 }
 0x5a2   : > { %v2045_v0 = vpop.f32.mrf.mxu1  ;;  %v2098_v53 = vpop.f32.mrf.mxu0 }
 0x5a3   : > { %v2097_v4 = vadd.f32 %v2096_v1, %v2044_v2  ;;  %v2046_v5 = vadd.f32 %v2045_v0, %v1485_v54  ;;  %v2210_v8 = vmax.f32 %v2095_v3, 0.0 }
 0x5a4   : > { %v2049_v13 = vpop.f32.mrf.mxu1  ;;  %v2102_v6 = vpop.f32.mrf.mxu0 }
 0x5a5   : > { %v2099_v16 = vadd.f32 %v2098_v53, %v2046_v5  ;;  %v2212_v15 = vmax.f32 %v2097_v4, 0.0  ;;  %v2050_v12 = vadd.f32 %v2049_v13, %v1481_v55 }
 0x5a6   : > { %v2051_v19 = vpop.f32.mrf.mxu1  ;;  %v2104_v7 = vpop.f32.mrf.mxu0 }
 0x5a7   : > { %v2213_v9 = vmax.f32 %v2099_v16, 0.0  ;;  %v2052_v10 = vadd.f32 %v2051_v19, %v1485_v54  ;;  %v2221_v21 = vpack.c.bf16 %v2212_v15, %v2209_v11  ;;  %v2103_v26 = vadd.f32 %v2102_v6, %v2050_v12 }
 0x5a8   : > { %v2053_v14 = vpop.f32.mrf.mxu1  ;;  %v2106_v17 = vpop.f32.mrf.mxu0 }
 0x5a9   : > { %v2222_v18 = vpack.c.bf16 %v2213_v9, %v2210_v8  ;;  %v2054_v20 = vadd.f32 %v2053_v14, %v1481_v55  ;;  %v2105_v23 = vadd.f32 %v2104_v7, %v2052_v10  ;;  %v2215_v32 = vmax.f32 %v2103_v26, 0.0 }
 0x5aa   : > { %v2055_v22 = vpop.f32.mrf.mxu1  ;;  %v2108_v27 = vpop.f32.mrf.mxu0 }
 0x5ab   : > { %v2107_v24 = vadd.f32 %v2106_v17, %v2054_v20  ;;  %v2056_v25 = vadd.f32 %v2055_v22, %v1485_v54  ;;  %2458 = vmatprep.mubr.bf16.mxu1 %v2222_v18  ;;  %v2216_v30 = vmax.f32 %v2105_v23, 0.0  ;;  %v2822_v20 = vld [vmem:[%s3980_s8] ss:$0 sm:$0xff] }
 0x5ac   : > { %2459 = vmatmul.mubr.bf16.vlgmr.msra.gmra.mxu1 %v2221_v21 }
 0x5ad   : > { %v2109_v28 = vadd.f32 %v2108_v27, %v2056_v25  ;;  %v2218_v29 = vmax.f32 %v2107_v24, 0.0 }
 0x5af   : > { %v2219_v31 = vmax.f32 %v2109_v28, 0.0  ;;  %v2224_v34 = vpack.c.bf16 %v2218_v29, %v2215_v32 }
 0x5b1   : > { %v2225_v33 = vpack.c.bf16 %v2219_v31, %v2216_v30 }
 0x5b3   : > { %2466 = vmatprep.mubr.bf16.mxu1 %v2225_v33 }
 0x5b4   : > { %2467 = vmatmul.mubr.bf16.gmra.mxu1 %v2224_v34 }
 0x5bc   : > { %v2892_v35 = vpop.f32.mrf.mxu1  ;;  %v2920_v36 = vpop.f32.mrf.mxu0 }
 0x5be   : > { %v2893_v38 = vpop.f32.mrf.mxu1  ;;  %v2921_v39 = vpop.f32.mrf.mxu0 }
 0x5bf   : > { %v2894_v40 = vadd.f32 %v2893_v38, %v2892_v35  ;;  %v2922_v47 = vadd.f32 %v2921_v39, %v2920_v36 }
 0x5c0   : > { %v2895_v41 = vpop.f32.mrf.mxu1  ;;  %v2923_v42 = vpop.f32.mrf.mxu0 }
 0x5c1   : > { %v2146_v43 = vadd.f32 %v2894_v40, %v1489_v37 }
 0x5c2   : > { %v2896_v44 = vpop.f32.mrf.mxu1  ;;  %v2924_v46 = vpop.f32.mrf.mxu0 }
 0x5c3   : > { %v2897_v48 = vadd.f32 %v2896_v44, %v2895_v41  ;;  %v2195_v51 = vadd.f32 %v2922_v47, %v2146_v43  ;;  %v2925_v55 = vadd.f32 %v2924_v46, %v2923_v42 }
 0x5c4   : > { %v2898_v49 = vpop.f32.mrf.mxu1  ;;  %v2926_v50 = vpop.f32.mrf.mxu0 }
 0x5c5   : > { %v2149_v54 = vadd.f32 %v2897_v48, %v1489_v37  ;;  %v2211_v61 = vmax.f32 %v2195_v51, 0.0 }
 0x5c6   : > { %v2899_v56 = vpop.f32.mrf.mxu1  ;;  %v2927_v57 = vpop.f32.mrf.mxu0 }
 0x5c7   : > { %v2198_v58 = vadd.f32 %v2925_v55, %v2149_v54  ;;  %v2900_v59 = vadd.f32 %v2899_v56, %v2898_v49  ;;  %v2928_v0 = vadd.f32 %v2927_v57, %v2926_v50 }
 0x5c8   : > { %v2901_v45 = vpop.f32.mrf.mxu1  ;;  %v2929_v52 = vpop.f32.mrf.mxu0 }
 0x5c9   : > { %v2214_v62 = vmax.f32 %v2198_v58, 0.0  ;;  %v2154_v63 = vadd.f32 %v2900_v59, %v1489_v37 }
 0x5ca   : > { %v2902_v1 = vpop.f32.mrf.mxu1  ;;  %v2930_v2 = vpop.f32.mrf.mxu0 }
 0x5cb   : > { %v2903_v53 = vadd.f32 %v2902_v1, %v2901_v45  ;;  %v2223_v3 = vpack.c.bf16 %v2214_v62, %v2211_v61  ;;  %v2203_v4 = vadd.f32 %v2928_v0, %v2154_v63  ;;  %v2931_v60 = vadd.f32 %v2930_v2, %v2929_v52 }
 0x5cd   : > { %v2157_v5 = vadd.f32 %v2903_v53, %v1489_v37  ;;  %3042 = vmatprep.mubr.bf16.mxu0 %v2223_v3  ;;  %v2217_v6 = vmax.f32 %v2203_v4, 0.0 }
 0x5cf   : > { %v2206_v13 = vadd.f32 %v2931_v60, %v2157_v5 }
 0x5d1   : > { %v2220_v16 = vmax.f32 %v2206_v13, 0.0 }
 0x5d3   : > { %v2226_v15 = vpack.c.bf16 %v2220_v16, %v2217_v6 }
 0x5d5   : > { %3043 = vmatmul.mubr.bf16.vlgmr.msra.gmra.mxu0 %v2226_v15 }
 0x66c   : > { %v2948_v19 = vpop.f32.mrf.mxu1 }
 0x66e   : > { %v2949_v7 = vpop.f32.mrf.mxu1 }
 0x66f   : > { %v2950_v18 = vadd.f32 %v2949_v7, %v2948_v19 }
 0x670   : > { %v2951_v8 = vpop.f32.mrf.mxu1 }
 0x671   : > { %v2461_v26 = vadd.f32 %v2950_v18, %v2822_v20 }
 0x672   : > { %v2952_v9 = vpop.f32.mrf.mxu1 }
 0x673   : > { %v2953_v24 = vadd.f32 %v2952_v9, %v2951_v8 }
 0x674   : > { %v2954_v10 = vpop.f32.mrf.mxu1 }
 0x675   : > { %v2464_v32 = vadd.f32 %v2953_v24, %v2822_v20 }
 0x676   : > { %v2955_v11 = vpop.f32.mrf.mxu1 }
 0x677   : > { %v2956_v14 = vadd.f32 %v2955_v11, %v2954_v10 }
 0x678   : > { %v2957_v12 = vpop.f32.mrf.mxu1 }
 0x679   : > { %v2469_v22 = vadd.f32 %v2956_v14, %v2822_v20 }
 0x67a   : > { %v2958_v17 = vpop.f32.mrf.mxu1 }
 0x67b   : > { %v2959_v21 = vadd.f32 %v2958_v17, %v2957_v12 }
 0x67d   : > { %v2472_v29 = vadd.f32 %v2959_v21, %v2822_v20 }
 0x695   : > { %v3044_v23 = vpop.f32.mrf.mxu0 }
 0x696   : > { %v2518_v25 = vadd.f32 %v3044_v23, %v2469_v22 }
 0x697   : > { %v2509_v27 = vpop.f32.mrf.mxu0 }
 0x698   : > { %3370 = vtanh.f32 %v2518_v25  ;;  %v2510_v28 = vadd.f32 %v2509_v27, %v2461_v26 }
 0x699   : > { %v3045_v30 = vpop.f32.mrf.mxu0 }
 0x69a   : > { %3372 = vtanh.f32 %v2510_v28  ;;  %v2521_v31 = vadd.f32 %v3045_v30, %v2472_v29 }
 0x69b   : > { %v2512_v33 = vpop.f32.mrf.mxu0 }
 0x69c   : > { %3374 = vtanh.f32 %v2521_v31  ;;  %v2513_v34 = vadd.f32 %v2512_v33, %v2464_v32 }
 0x69e   : > { %3376 = vtanh.f32 %v2513_v34 }
 0x6a5   : > { %v3371_v35 = vpop.eup %3370 }
 0x6a6   : > { %v2530_v36 = vmul.f32 2.0, %v3371_v35 }
 0x6a7   : > { %v3373_v37 = vpop.eup %3372 }
 0x6a8   : > { %2534 = vst [vmem:[%s408_s26 + $0x10] sm:$0xff] %v2530_v36  ;;  %v2528_v38 = vmul.f32 2.0, %v3373_v37 }
 0x6a9   : > { %v3375_v39 = vpop.eup %3374 }
 0x6aa   : > { %2532 = vst [vmem:[%s408_s26] sm:$0xff] %v2528_v38  ;;  %v2531_v40 = vmul.f32 2.0, %v3375_v39 }
 0x6ab   : > { %v3377_v41 = vpop.eup %3376 }
 0x6ac   : > { %2535 = vst [vmem:[%s408_s26 + $0x18] sm:$0xff] %v2531_v40  ;;  %v2529_v42 = vmul.f32 2.0, %v3377_v41 }
 0x6ae   : > { %2533 = vst [vmem:[%s408_s26 + $0x8] sm:$0xff] %v2529_v42 }
 0x6af   : > { %3523 = shalt.err (!%p3520_p0)
}
 0x6b0   : > { %s3524_s23 = scalar_lea.hbm %s3930_s15, 512  ;;  %s3528_s20 = scalar_lea.hbm %s3981_s9, 2048 }
 0x6b1   : > { %p3525_p4 = scmp.ne.s32.totalorder %s3930_s15, %s3524_s23  ;;  %p3529_p10 = scmp.lt.s32.totalorder %s3930_s15, %s3981_s9 }
 0x6b2   : > { %p3530_p5 = scmp.lt.s32.totalorder %s3528_s20, %s3524_s23 }
 0x6b3   : > { %p3526_p8 = pnand %p3525_p4, %p4005_p1 }
 0x6b4   : > { %p3531_p7 = por %p3530_p5, %p3529_p10 }
 0x6b5   : > { %p3527_p6 = pneg %p3526_p8 }
 0x6b7   : > { %p3532_p11 = pnand %p3531_p7, %p3527_p6 }
 0x6b9   : > { %3535 = shalt.err (!%p3532_p11)
}
 0x6ba   : > { %s3601_s22 = smov 128   ;;  %s3602_s14 = smov 8  }
 0x6bb   : > { %3064 = dma.vmem_to_hbm [thread:$0]  (%p4005_p1), %s3925_s1, 512, %s3930_s15, %s2537_s5, %s3601_s22, %s3601_s22, %s3602_s14  }
 0x6bc PF: > { %p3096_p9 = scmp.ge.s32.totalorder %s3582_s12, 2  ;;  %s2565_s17 = sand.u32 1, %s3570_s30  }
 0x6bd   : > { %p4006_p12 = scmp.ne.s32.totalorder %s3990_s16, 0  ;;  %s2566_s13 = scalar_lea.sflag [#allocation4], %s2565_s17 }
 0x6bf   : > { %p3084_p2 = pnand %p3096_p9, %p4006_p12 }
 0x6c1   : > { %p3085_p13 = pneg %p3084_p2 }
 0x6c3   : > { %3565 = dma.done.wait (%p3085_p13), %s2566_s13, 512  }
 0x6c4   : > { %3567 = vsyncadd (%p3085_p13), %s2566_s13, 4294966784  ;;  %p24_p3 = scmp.ge.s32.totalorder %s3740_s19, 6   ;;  %s4007_s30 = smov %s3574_s10 }
 0x6c5   : > { %s4008_s10 = smov %s3578_s11  ;;  %s4009_s11 = smov %s3749_s28 }
 0x6c6   : > { %s4010_s12 = smov %s3740_s19  ;;  %26 = sbr.rel (!%p24_p3) target bundleno = 11 (0xb), region = 117 }
 0x6cb   :  { %2571 = vsyncpa [#allocation3], 1 }
 0x6cc   :  { %2573 = vsyncpa [#allocation3 + $0x1], 1 }
 0x6cd   :  { %2574 = vsyncpa [#allocation6], 1 }
 0x6ce   :  { %2575 = vsyncpa [#allocation9], 1 }
 0x6cf   :  { %2576 = vsyncpa [#allocation4], 1 }
 0x6d0   :  { %2578 = vsyncpa [#allocation4 + $0x1], 1 }

</bundles_post_ra>
